<compile_context>
chip_gen: v5e
topology: v5e:2x2
jax: 0.10.0
libtpu: 0.0.40
codegen_flags: <defaults>
</compile_context>

<pallas_src>
import math

import jax
import jax.numpy as jnp
from jax import lax
from jax.experimental import pallas as pl
from jax.experimental.pallas import tpu as pltpu

LN_EPS = 1e-5
INV_SQRT2 = 1.0 / math.sqrt(2.0)


def attention_pooling_kernel(x_ref, w1t_ref, aux_ref, out_ref, attn_ref):
    TB, n, d, HW = x_ref.shape
    hid = w1t_ref.shape[0]
    B = TB * n

    x = x_ref[...]                          # (TB, n, d, HW) f32, HW in lanes

    # Small per-feature params with hid on sublanes -> broadcast over HW lanes.
    b1 = aux_ref[:, 0:1]                    # (hid, 1)
    gamma = aux_ref[:, 1:2]
    beta = aux_ref[:, 2:3]
    w2 = aux_ref[:, 3:4]
    b2 = aux_ref[0:1, 4:5]                  # (1, 1)

    # Linear 1 as a batched MXU matmul: (hid, d) @ (d, HW) per (batch, slice).
    # Only leading dims are reshaped (tiled (., HW) dims untouched -> free).
    xm = x.reshape(B, d, HW)
    w1b = jnp.broadcast_to(w1t_ref[...].astype(jnp.bfloat16), (B, hid, d))
    h1 = jnp.einsum('bhd,bdw->bhw', w1b, xm.astype(jnp.bfloat16),
                    preferred_element_type=jnp.float32)        # (B, hid, HW)
    h1 = h1.reshape(TB, n, hid, HW) + b1                       # (TB, n, hid, HW)

    # LayerNorm over hid (sublane reduction; PyTorch default eps=1e-5).
    mean = jnp.mean(h1, axis=2, keepdims=True)
    cent = h1 - mean
    var = jnp.mean(cent * cent, axis=2, keepdims=True)
    hn = cent * lax.rsqrt(var + LN_EPS) * gamma + beta

    # Exact (erf) GELU, matching nn.GELU() default.
    g = 0.5 * hn * (1.0 + lax.erf(hn * INV_SQRT2))

    # Linear 2 (hid -> 1): sublane reduction over hid.
    logits = jnp.sum(g * w2, axis=2, keepdims=True) + b2       # (TB, n, 1, HW)

    # TODO(synk): optional `mask` argument (attn_logits[mask] = -inf) not implemented.

    # Softmax over the slice axis n: reductions over n are cross-slab VALU ops,
    # every vreg carries a full lane of HW values; reciprocal goes to the EUP.
    mx = jnp.max(logits, axis=1, keepdims=True)                # (TB, 1, 1, HW)
    e = jnp.exp(logits - mx)
    denom = jnp.sum(e, axis=1, keepdims=True)
    wts = e * pl.reciprocal(denom, approx=False)               # (TB, n, 1, HW)

    # Lane-dense attention-weight store; trailing (..., 1) re-added outside.
    attn_ref[...] = wts.reshape(TB, n, HW).astype(attn_ref.dtype)

    # Weighted sum over n: wts broadcasts over the d sublanes; result is
    # already (TB, d, HW) NCHW -> lane-dense store, no transpose.
    out_ref[...] = jnp.sum(wts * x, axis=1).astype(out_ref.dtype)


def _block_vmem_bytes(block_bs, n, d, hid, HW):
    """Conservative live-VMEM estimate for one grid step (f32 input)."""
    B = block_bs * n
    xblk = B * d * HW * 4                  # one f32 x block
    hblk = B * hid * HW * 4                # one (.., hid, HW) f32 activation
    sblk = B * 8 * HW * 4                  # (n, 1, HW) temps, 8-sublane padded
    oblk = block_bs * d * HW * 4
    ablk = B * HW * 4
    return (2 * xblk                       # double-buffered x input block
            + xblk                         # wts * x product / working copy
            + xblk // 2                    # bf16 copy of x feeding the MXU
            + B * hid * d * 2              # broadcast bf16 W1
            + 5 * hblk                     # h1 + LayerNorm / GELU temporaries
            + 4 * sblk                     # logits / softmax temporaries
            + 2 * (oblk + ablk)            # double-buffered outputs
            + (2 << 20))                   # padding / compiler scratch headroom


def _chip_budgets():
    """(per-block VMEM budget, vmem_limit cap, min grid steps) by generation."""
    try:
        cap = int(pltpu.get_tpu_info().vmem_capacity_bytes)
    except Exception:                      # conservative fallback
        cap = 64 << 20
    if cap >= (96 << 20):
        # v5e / v6e: 128 MiB VMEM, single TensorCore -> big blocks.
        return int(0.45 * cap), int(0.70 * cap), 2
    # v7x-class: 64 MiB VMEM, 2 TensorCores -> tight budget, >=2 steps/core.
    return int(0.30 * cap), int(0.68 * cap), 4


def _pick_block_bs(bs, n, d, hid, HW, budget, min_steps):
    best = 1
    for tb in range(1, bs + 1):
        if bs % tb:
            continue
        if _block_vmem_bytes(tb, n, d, hid, HW) > budget:
            break
        if tb == 1 or bs // tb >= min_steps:
            best = tb
    return best


def attention_pooling(x_nchw, bs, params, block_bs=None):
    """params = (W1 (d,hid), b1 (hid,), gamma (hid,), beta (hid,), W2 (hid,), b2 ())."""
    N, d, h, w = x_nchw.shape
    assert N % bs == 0
    n = N // bs
    HW = h * w
    W1, b1, gamma, beta, W2, b2 = params
    hid = W1.shape[1]

    # NCHW -> (bs, n, d, HW): pure reshape, no HBM transpose round-trip.
    xk = x_nchw.reshape(bs, n, d, HW)

    # W1 transposed once (tiny) so the kernel contracts d without moving x.
    w1t = jnp.transpose(W1).astype(jnp.float32)                 # (hid, d)

    # Per-hid params stacked with hid on sublanes -> broadcast over HW lanes.
    aux = jnp.stack([
        b1.astype(jnp.float32),
        gamma.astype(jnp.float32),
        beta.astype(jnp.float32),
        W2.astype(jnp.float32),
        jnp.full((hid,), b2, dtype=jnp.float32),
    ], axis=1)                                                   # (hid, 5)

    budget, limit_cap, min_steps = _chip_budgets()
    if block_bs is None:
        block_bs = _pick_block_bs(bs, n, d, hid, HW, budget, min_steps)
    assert bs % block_bs == 0
    grid = (bs // block_bs,)

    est = _block_vmem_bytes(block_bs, n, d, hid, HW)
    vmem_limit = int(min(limit_cap, max(16 << 20, est + (2 << 20))))

    out, attn = pl.pallas_call(
        attention_pooling_kernel,
        out_shape=(jax.ShapeDtypeStruct((bs, d, HW), x_nchw.dtype),
                   jax.ShapeDtypeStruct((bs, n, HW), jnp.float32)),
        grid_spec=pltpu.PrefetchScalarGridSpec(
            num_scalar_prefetch=0,
            grid=grid,
            in_specs=[
                pl.BlockSpec((block_bs, n, d, HW), lambda b: (b, 0, 0, 0)),
                pl.BlockSpec((hid, d), lambda b: (0, 0)),
                pl.BlockSpec((hid, 5), lambda b: (0, 0)),
            ],
            out_specs=[
                pl.BlockSpec((block_bs, d, HW), lambda b: (b, 0, 0)),
                pl.BlockSpec((block_bs, n, HW), lambda b: (b, 0, 0)),
            ],
        ),
        compiler_params=pltpu.CompilerParams(
            dimension_semantics=("parallel",),
            vmem_limit_bytes=vmem_limit),
    )(xk, w1t, aux)

    pooled = out.reshape(bs, d, h, w)               # already NCHW, free reshape
    attn_weights = attn.reshape(bs, n, h, w, 1)     # free reshape, PyTorch shape
    return pooled, attn_weights


def reference(x_nchw, bs, params):
    """Plain-JAX mirror of the PyTorch forward (no mask); Linear-1 pinned to
    bf16 inputs / f32 accumulation to match the kernel's MXU path."""
    N, d, h, w = x_nchw.shape
    n = N // bs
    W1, b1, gamma, beta, W2, b2 = params
    xp = x_nchw.reshape(bs, n, d, h, w).transpose(0, 1, 3, 4, 2)   # (bs,n,h,w,d)
    h1 = jnp.einsum('bnhwd,de->bnhwe',
                    xp.astype(jnp.bfloat16), W1.astype(jnp.bfloat16),
                    preferred_element_type=jnp.float32) + b1
    mean = h1.mean(-1, keepdims=True)
    var = ((h1 - mean) ** 2).mean(-1, keepdims=True)
    hn = (h1 - mean) / jnp.sqrt(var + LN_EPS) * gamma + beta
    g = 0.5 * hn * (1.0 + lax.erf(hn * INV_SQRT2))
    logits = (g * W2).sum(-1)[..., None] + b2                      # (bs,n,h,w,1)
    wts = jax.nn.softmax(logits, axis=1)
    pooled = (wts * xp).sum(axis=1).transpose(0, 3, 1, 2)
    return pooled, wts


if __name__ == "__main__":
    # embedding_size = d = 16, hid = 16, bs = 2, n = 4 slices, 8x8 spatial
    bs, n, d, h, w, hid = 2, 4, 16, 8, 8, 16
    N = bs * n

    key = jax.random.PRNGKey(0)
    kx, k1, k2, k3, k4 = jax.random.split(key, 5)

    x = jax.random.normal(kx, (N, d, h, w), dtype=jnp.float32)

    W1 = jax.random.normal(k1, (d, hid), dtype=jnp.float32) * 0.1
    b1 = jax.random.normal(k2, (hid,), dtype=jnp.float32) * 0.1
    gamma = jnp.ones((hid,), dtype=jnp.float32)
    beta = jnp.zeros((hid,), dtype=jnp.float32)
    W2 = jax.random.normal(k3, (hid,), dtype=jnp.float32) * 0.1
    b2 = (jax.random.normal(k4, (), dtype=jnp.float32) * 0.1)
    params = (W1, b1, gamma, beta, W2, b2)

    pooled, attn_w = attention_pooling(x, bs, params)
    pooled = jax.block_until_ready(pooled)
    attn_w = jax.block_until_ready(attn_w)

    ref_pooled, ref_attn = reference(x, bs, params)

    assert pooled.shape == (bs, d, h, w)
    assert attn_w.shape == (bs, n, h, w, 1)
    assert jnp.allclose(pooled, ref_pooled, atol=1e-4, rtol=1e-4)
    assert jnp.allclose(attn_w, ref_attn, atol=1e-4, rtol=1e-4)

    print("KERNEL_OK")
</pallas_src>

<mosaic_0001>
module attributes {stable_mosaic.version = 11 : i64} {
  func.func @attention_pooling_kernel(%arg0: i32, %arg1: memref<1x4x16x64xf32, #tpu.memory_space<vmem>>, %arg2: memref<16x16xf32, #tpu.memory_space<vmem>>, %arg3: memref<16x5xf32, #tpu.memory_space<vmem>>, %arg4: memref<1x16x64xf32, #tpu.memory_space<vmem>>, %arg5: memref<1x4x64xf32, #tpu.memory_space<vmem>>) attributes {dimension_semantics = [#tpu.dimension_semantics<parallel>], iteration_bounds = array<i64: 2>, scalar_prefetch = 0 : i64, scratch_operands = 0 : i64, tpu.core_type = #tpu.core_type<tc>, window_params = [{transform_indices = @transform_0, window_bounds = array<i64: 1, 4, 16, 64>}, {pipeline_mode = #tpu.pipeline_mode<synchronous>, transform_indices = @transform_1, window_bounds = array<i64: 16, 16>}, {pipeline_mode = #tpu.pipeline_mode<synchronous>, transform_indices = @transform_2, window_bounds = array<i64: 16, 5>}, {transform_indices = @transform_3, window_bounds = array<i64: 1, 16, 64>}, {transform_indices = @transform_4, window_bounds = array<i64: 1, 4, 64>}]} {
    %c0 = arith.constant 0 : index
    %c0_0 = arith.constant 0 : index
    %c0_1 = arith.constant 0 : index
    %c0_2 = arith.constant 0 : index
    %0 = vector.load %arg1[%c0, %c0_0, %c0_1, %c0_2] : memref<1x4x16x64xf32, #tpu.memory_space<vmem>>, vector<1x4x16x64xf32>
    %c0_3 = arith.constant 0 : index
    %c0_4 = arith.constant 0 : index
    %1 = vector.load %arg3[%c0_3, %c0_4] : memref<16x5xf32, #tpu.memory_space<vmem>>, vector<16x1xf32>
    %c0_5 = arith.constant 0 : index
    %c1 = arith.constant 1 : index
    %2 = vector.load %arg3[%c0_5, %c1] : memref<16x5xf32, #tpu.memory_space<vmem>>, vector<16x1xf32>
    %c0_6 = arith.constant 0 : index
    %c2 = arith.constant 2 : index
    %3 = vector.load %arg3[%c0_6, %c2] : memref<16x5xf32, #tpu.memory_space<vmem>>, vector<16x1xf32>
    %c0_7 = arith.constant 0 : index
    %c3 = arith.constant 3 : index
    %4 = vector.load %arg3[%c0_7, %c3] : memref<16x5xf32, #tpu.memory_space<vmem>>, vector<16x1xf32>
    %c0_8 = arith.constant 0 : index
    %c4 = arith.constant 4 : index
    %5 = vector.load %arg3[%c0_8, %c4] : memref<16x5xf32, #tpu.memory_space<vmem>>, vector<1x1xf32>
    %6 = vector.shape_cast %0 : vector<1x4x16x64xf32> to vector<4x16x64xf32>
    %c0_9 = arith.constant 0 : index
    %c0_10 = arith.constant 0 : index
    %7 = vector.load %arg2[%c0_9, %c0_10] : memref<16x16xf32, #tpu.memory_space<vmem>>, vector<16x16xf32>
    %8 = arith.truncf %7 : vector<16x16xf32> to vector<16x16xbf16>
    %9 = vector.shape_cast %8 : vector<16x16xbf16> to vector<1x16x16xbf16>
    %10 = vector.broadcast %9 : vector<1x16x16xbf16> to vector<4x16x16xbf16>
    %11 = arith.truncf %6 : vector<4x16x64xf32> to vector<4x16x64xbf16>
    "tpu.trace_start"() <{level = 10 : i32, message = "bhd,bdw->bhw"}> : () -> ()
    %cst = arith.constant dense<0.000000e+00> : vector<4x16x64xf32>
    %12 = tpu.matmul %10, %11, %cst {dimension_numbers = #tpu.dot_dimension_numbers<[2], [1], [1], [2], [0, 0, 0, 1, 1, 2], [0], [0]>} : vector<4x16x16xbf16>, vector<4x16x64xbf16>, vector<4x16x64xf32> -> vector<4x16x64xf32>
    "tpu.trace_stop"() : () -> ()
    %13 = vector.shape_cast %12 : vector<4x16x64xf32> to vector<1x4x16x64xf32>
    %14 = vector.shape_cast %1 : vector<16x1xf32> to vector<1x1x16x1xf32>
    %15 = vector.broadcast %14 : vector<1x1x16x1xf32> to vector<1x4x16x64xf32>
    %16 = arith.addf %13, %15 : vector<1x4x16x64xf32>
    %cst_11 = arith.constant dense<0.000000e+00> : vector<1x4x64xf32>
    %17 = vector.multi_reduction <add>, %16, %cst_11 [2] : vector<1x4x16x64xf32> to vector<1x4x64xf32>
    %18 = vector.shape_cast %17 : vector<1x4x64xf32> to vector<1x4x1x64xf32>
    %cst_12 = arith.constant 1.600000e+01 : f32
    %19 = vector.broadcast %cst_12 : f32 to vector<1x4x1x64xf32>
    %20 = arith.divf %18, %19 : vector<1x4x1x64xf32>
    %21 = vector.broadcast %20 : vector<1x4x1x64xf32> to vector<1x4x16x64xf32>
    %22 = arith.subf %16, %21 : vector<1x4x16x64xf32>
    %23 = arith.mulf %22, %22 : vector<1x4x16x64xf32>
    %cst_13 = arith.constant dense<0.000000e+00> : vector<1x4x64xf32>
    %24 = vector.multi_reduction <add>, %23, %cst_13 [2] : vector<1x4x16x64xf32> to vector<1x4x64xf32>
    %25 = vector.shape_cast %24 : vector<1x4x64xf32> to vector<1x4x1x64xf32>
    %cst_14 = arith.constant 1.600000e+01 : f32
    %26 = vector.broadcast %cst_14 : f32 to vector<1x4x1x64xf32>
    %27 = arith.divf %25, %26 : vector<1x4x1x64xf32>
    %cst_15 = arith.constant 9.99999974E-6 : f32
    %28 = vector.broadcast %cst_15 : f32 to vector<1x4x1x64xf32>
    %29 = arith.addf %27, %28 : vector<1x4x1x64xf32>
    %30 = math.rsqrt %29 : vector<1x4x1x64xf32>
    %31 = vector.broadcast %30 : vector<1x4x1x64xf32> to vector<1x4x16x64xf32>
    %32 = arith.mulf %22, %31 : vector<1x4x16x64xf32>
    %33 = vector.shape_cast %2 : vector<16x1xf32> to vector<1x1x16x1xf32>
    %34 = vector.broadcast %33 : vector<1x1x16x1xf32> to vector<1x4x16x64xf32>
    %35 = arith.mulf %32, %34 : vector<1x4x16x64xf32>
    %36 = vector.shape_cast %3 : vector<16x1xf32> to vector<1x1x16x1xf32>
    %37 = vector.broadcast %36 : vector<1x1x16x1xf32> to vector<1x4x16x64xf32>
    %38 = arith.addf %35, %37 : vector<1x4x16x64xf32>
    %cst_16 = arith.constant 5.000000e-01 : f32
    %39 = vector.broadcast %cst_16 : f32 to vector<1x4x16x64xf32>
    %40 = arith.mulf %39, %38 : vector<1x4x16x64xf32>
    %cst_17 = arith.constant 0.707106769 : f32
    %41 = vector.broadcast %cst_17 : f32 to vector<1x4x16x64xf32>
    %42 = arith.mulf %38, %41 : vector<1x4x16x64xf32>
    %43 = math.erf %42 : vector<1x4x16x64xf32>
    %cst_18 = arith.constant 1.000000e+00 : f32
    %44 = vector.broadcast %cst_18 : f32 to vector<1x4x16x64xf32>
    %45 = arith.addf %44, %43 : vector<1x4x16x64xf32>
    %46 = arith.mulf %40, %45 : vector<1x4x16x64xf32>
    %47 = vector.shape_cast %4 : vector<16x1xf32> to vector<1x1x16x1xf32>
    %48 = vector.broadcast %47 : vector<1x1x16x1xf32> to vector<1x4x16x64xf32>
    %49 = arith.mulf %46, %48 : vector<1x4x16x64xf32>
    %cst_19 = arith.constant dense<0.000000e+00> : vector<1x4x64xf32>
    %50 = vector.multi_reduction <add>, %49, %cst_19 [2] : vector<1x4x16x64xf32> to vector<1x4x64xf32>
    %51 = vector.shape_cast %50 : vector<1x4x64xf32> to vector<1x4x1x64xf32>
    %52 = vector.shape_cast %5 : vector<1x1xf32> to vector<1x1x1x1xf32>
    %53 = vector.broadcast %52 : vector<1x1x1x1xf32> to vector<1x4x1x64xf32>
    %54 = arith.addf %51, %53 : vector<1x4x1x64xf32>
    %cst_20 = arith.constant dense<0xFF800000> : vector<1x1x64xf32>
    %55 = vector.multi_reduction <maximumf>, %54, %cst_20 [1] : vector<1x4x1x64xf32> to vector<1x1x64xf32>
    %56 = vector.shape_cast %55 : vector<1x1x64xf32> to vector<1x1x1x64xf32>
    %57 = vector.broadcast %56 : vector<1x1x1x64xf32> to vector<1x4x1x64xf32>
    %58 = arith.subf %54, %57 : vector<1x4x1x64xf32>
    %59 = math.exp %58 : vector<1x4x1x64xf32>
    %cst_21 = arith.constant dense<0.000000e+00> : vector<1x1x64xf32>
    %60 = vector.multi_reduction <add>, %59, %cst_21 [1] : vector<1x4x1x64xf32> to vector<1x1x64xf32>
    %61 = vector.shape_cast %60 : vector<1x1x64xf32> to vector<1x1x1x64xf32>
    %62 = tpu.reciprocal %61 : vector<1x1x1x64xf32> -> vector<1x1x1x64xf32>
    %63 = vector.broadcast %62 : vector<1x1x1x64xf32> to vector<1x4x1x64xf32>
    %64 = arith.mulf %59, %63 : vector<1x4x1x64xf32>
    %65 = vector.shape_cast %64 : vector<1x4x1x64xf32> to vector<1x4x64xf32>
    %c0_22 = arith.constant 0 : index
    %c0_23 = arith.constant 0 : index
    %c0_24 = arith.constant 0 : index
    %66 = vector.load %arg5[%c0_22, %c0_23, %c0_24] : memref<1x4x64xf32, #tpu.memory_space<vmem>>, vector<1x4x64xf32>
    tpu.vector_store %arg5[%c0_22, %c0_23, %c0_24], %65 {strides = array<i32>} : memref<1x4x64xf32, #tpu.memory_space<vmem>>, vector<1x4x64xf32>,
    %67 = vector.broadcast %64 : vector<1x4x1x64xf32> to vector<1x4x16x64xf32>
    %68 = arith.mulf %67, %0 : vector<1x4x16x64xf32>
    %cst_25 = arith.constant dense<0.000000e+00> : vector<1x16x64xf32>
    %69 = vector.multi_reduction <add>, %68, %cst_25 [1] : vector<1x4x16x64xf32> to vector<1x16x64xf32>
    %c0_26 = arith.constant 0 : index
    %c0_27 = arith.constant 0 : index
    %c0_28 = arith.constant 0 : index
    %70 = vector.load %arg4[%c0_26, %c0_27, %c0_28] : memref<1x16x64xf32, #tpu.memory_space<vmem>>, vector<1x16x64xf32>
    tpu.vector_store %arg4[%c0_26, %c0_27, %c0_28], %69 {strides = array<i32>} : memref<1x16x64xf32, #tpu.memory_space<vmem>>, vector<1x16x64xf32>,
    return
  }
  func.func @transform_0(%arg0: i32) -> (i32, i32, i32, i32) {
    %c0_i32 = arith.constant 0 : i32
    %c0_i32_0 = arith.constant 0 : i32
    %c0_i32_1 = arith.constant 0 : i32
    %c0_i32_2 = arith.constant 0 : i32
    return %arg0, %c0_i32, %c0_i32_0, %c0_i32_1 : i32, i32, i32, i32
  }
  func.func @transform_1(%arg0: i32) -> (i32, i32) {
    %c0_i32 = arith.constant 0 : i32
    %c0_i32_0 = arith.constant 0 : i32
    %c0_i32_1 = arith.constant 0 : i32
    return %c0_i32, %c0_i32_0 : i32, i32
  }
  func.func @transform_2(%arg0: i32) -> (i32, i32) {
    %c0_i32 = arith.constant 0 : i32
    %c0_i32_0 = arith.constant 0 : i32
    %c0_i32_1 = arith.constant 0 : i32
    return %c0_i32, %c0_i32_0 : i32, i32
  }
  func.func @transform_3(%arg0: i32) -> (i32, i32, i32) {
    %c0_i32 = arith.constant 0 : i32
    %c0_i32_0 = arith.constant 0 : i32
    %c0_i32_1 = arith.constant 0 : i32
    return %arg0, %c0_i32, %c0_i32_0 : i32, i32, i32
  }
  func.func @transform_4(%arg0: i32) -> (i32, i32, i32) {
    %c0_i32 = arith.constant 0 : i32
    %c0_i32_0 = arith.constant 0 : i32
    %c0_i32_1 = arith.constant 0 : i32
    return %arg0, %c0_i32, %c0_i32_0 : i32, i32, i32
  }
}

</mosaic_0001>

<bundles_post_ra>
// kernel: tpu_custom_call.1
= control target key start
LH: loop header
LB: loop body
LE: loop exit
PB: predicated region body
PF: predicated region fallthrough
CT: control target
= control target key end

     0   :  { %10 = vsyncpa [#allocation3], 0  ;;  %s2137_s0 = inlined_call_operand.hbm [shape: f32[2,4,16,64], index: 0, kind: input, shape index: {}]   ;;  %s2138_s1 = inlined_call_operand.vmem [shape: f32[16,16], index: 1, kind: input, shape index: {}]   ;;  %s2139_s2 = inlined_call_operand.vmem [shape: f32[16,5], index: 2, kind: input, shape index: {}]   ;;  %s2140_s3 = inlined_call_operand.hbm [shape: f32[2,16,64], index: 3, kind: output, shape index: {0}]   ;;  %s2141_s4 = inlined_call_operand.hbm [shape: f32[2,4,64], index: 4, kind: output, shape index: {1}]  }
   0x1   :  { %12 = vsyncpa [#allocation3 + $0x1], 0 }
   0x2   :  { %13 = vsyncpa [#allocation4], 0 }
   0x3   :  { %15 = vsyncpa [#allocation4 + $0x1], 0 }
   0x4   :  { %16 = vsyncpa [#allocation7], 0 }
   0x5   :  { %18 = vsyncpa [#allocation7 + $0x1], 0  ;;  %s1499_s15 = smov 0   ;;  %s1501_s16 = smov 0  }
   0x6   :  { %s1503_s17 = smov 0   ;;  %s1505_s18 = smov 0  }
   0x7 LB: > { %s1520_s19 = sadd.s32 4294967295, %s1462_s18   ;;  %s1191_s20 = sadd.s32 4294967294, %s1462_s18   ;;  %s1462_s18 = sphi %s1505_s18, %s2159_s18   ;;  %s1458_s17 = sphi %s1503_s17, %s2158_s17   ;;  %s1454_s16 = sphi %s1501_s16, %s2157_s16   ;;  %s1450_s15 = sphi %s1499_s15, %s2156_s15  }
   0x8   : > { %s1524_s21 = sadd.s32 1, %s1462_s18   ;;  %s31_s22 = sadd.s32 1, %s1458_s17 }
   0x9   : > { %s28_s23 = ssub.s32 %s1462_s18, %s1524_s21  ;;  %p38_p0 = scmp.ne.s32.totalorder %s1458_s17, %s1454_s16 }
   0xa   : > { %p29_p1 = scmp.eq.s32.totalorder %s28_s23, 0  ;;  %p39_p2 = scmp.eq.s32.totalorder %s1462_s18, 0 }
   0xb   : > { %p44_p3 = scmp.ne.s32.totalorder %s1454_s16, %s1450_s15  ;;  %p45_p4 = scmp.eq.s32.totalorder %s1520_s19, 0 }
   0xc   : > { %s1536_s24 = scalar_select %p29_p1, %s1458_s17, %s31_s22  }
   0xd   : > { %p1538_p5 = por %p39_p2, %p38_p0  ;;  %p1542_p6 = por %p45_p4, %p44_p3 }
   0xe   : > { %p110_p7 = scmp.eq.s32.totalorder %s1520_s19, 1  ;;  %p116_p8 = scmp.eq.s32.totalorder %s1191_s20, 1 }
   0xf   : > { %p1239_p10 = scmp.lt.s32.totalorder %s1462_s18, 2  ;;  %s168_s29 = sand.u32 1, %s1458_s17  }
  0x10   : > { %p1549_p11 = por %p110_p7, %p38_p0  ;;  %p1553_p12 = por %p116_p8, %p44_p3 }
  0x11   : > { %s1220_s30 = sshll.u32 %s1462_s18, 6  ;;  %s1194_s5 = sshll.u32 %s168_s29, 6 }
  0x12   : > { %s177_s8 = scalar_lea.hbm %s2137_s0, %s1220_s30  ;;  %s172_s10 = scalar_lea.vmem [#allocation2], %s1194_s5 }
  0x13   : > { %s178_s9 = sshll.u32 %s177_s8, 4  ;;  %s180_s11 = sshll.u32 %s172_s10, 4  ;;  %s179_s9 = int_to_ptr.hbm [resolvable:$true] %s178_s9  ;;  %s181_s11 = int_to_ptr.vmem [resolvable:$true] %s180_s11 }
  0x14   : > { %p1564_p13 = pnand %p1239_p10, %p1538_p5  ;;  %p1197_p0 = scmp.ge.s32.totalorder %s1462_s18, 1 }
  0x15   : > { %p188_p1 = scmp.lt.s32.totalorder %s1462_s18, 3  ;;  %s169_s13 = scalar_lea.sflag [#allocation3], %s168_s29 }
  0x16   : > { %s1334_s14 = sshra.s32 %s179_s9, 4  ;;  %p1338_p3 = pneg %p1564_p13  ;;  %s1335_s14 = int_to_ptr.hbm [resolvable:$true] %s1334_s14 }
  0x17   : > { %s1336_s20 = scalar_lea.hbm %s1335_s14, 64  ;;  %s1341_s25 = scalar_lea.hbm %s2137_s0, 128 }
  0x18   : > { %p1337_p2 = scmp.ne.s32.totalorder %s1335_s14, %s1336_s20  ;;  %p1342_p5 = scmp.lt.s32.totalorder %s1335_s14, %s2137_s0 }
  0x19   : > { %p1343_p8 = scmp.lt.s32.totalorder %s1341_s25, %s1336_s20 }
  0x1a   : > { %p1339_p4 = pnand %p1338_p3, %p1337_p2 }
  0x1b   : > { %p1344_p10 = por %p1343_p8, %p1342_p5 }
  0x1c   : > { %p1340_p7 = pneg %p1339_p4 }
  0x1e   : > { %p1345_p9 = pnand %p1344_p10, %p1340_p7 }
  0x20   : > { %1348 = shalt.err (!%p1345_p9)
}
  0x21   : > { %s1464_s29 = smov 128   ;;  %s1465_s6 = smov 8  }
  0x22   : > { %1231 = dma.hbm_to_vmem [thread:$0]  (!%p1564_p13), %s179_s9, 1024, %s181_s11, %s169_s13, %s1464_s29, %s1464_s29, %s1465_s6  }
  0x23   : > { %p189_p2 = pnand %p1197_p0, %p188_p1 }
  0x24   : > { %s1585_s7 = sand.u32 (!%p189_p2), 1, %s1454_s16  }
  0x25   : > { %192 = sbr.rel (%p189_p2) target bundleno = 442 (0x1ba), region = 32  ;;  %s1198_s8 = sshll.u32 (!%p189_p2), %s1585_s7, 6 }
  0x26   : > { %s195_s10 = scalar_lea.sflag (!%p189_p2), [#allocation3], %s1585_s7  ;;  %s1589_s14 = scalar_lea.vmem (!%p189_p2), [#allocation2], %s1198_s8 }
  0x2a   : > { %1437 = dma.done.wait (%p1542_p6), %s195_s10, 1024  }
  0x2b   : > { %1439 = vsyncadd (%p1542_p6), %s195_s10, 4294966272  ;;  %v1466_v0 = vmov 0   ;;  %v1467_v1 = vmov 1   ;;  %v1468_v2 = vmov 2   ;;  %v230_v3 = vld [vmem:[%s1589_s14] sm:$0xff]  ;;  %v231_v4 = vld [vmem:[%s1589_s14 + $0x8] sm:$0xff] }
  0x2c   : > { %1283 = vset.pattern.permute.xlu0 %v1466_v0  ;;  %1284 = vset.pattern.permute.xlu1 %v1467_v1  ;;  %v232_v5 = vld [vmem:[%s1589_s14 + $0x10] sm:$0xff]  ;;  %v245_v6 = vpack.c.bf16 %v230_v3, %v230_v3  ;;  %v246_v7 = vpack.c.bf16 %v231_v4, %v231_v4  ;;  %v233_v8 = vld [vmem:[%s1589_s14 + $0x18] sm:$0xff]  ;;  %v234_v10 = vld [vmem:[%s1589_s14 + $0x20] sm:$0xff]  ;;  %vm264_vm0 = vcmask 130048   ;;  %v1469_v40 = vmov 3   ;;  %s1217_s5 = sshll.u32 %s1520_s19, 2 }
  0x2d   : > { %1285 = vset.pattern.permute.xlu2 %v1468_v2  ;;  %v247_v9 = vpack.c.bf16 %v232_v5, %v232_v5  ;;  %v235_v11 = vld [vmem:[%s1589_s14 + $0x28] sm:$0xff]  ;;  %v248_v12 = vpack.c.bf16 %v233_v8, %v233_v8  ;;  %v249_v13 = vpack.c.bf16 %v234_v10, %v234_v10  ;;  %v236_v15 = vld [vmem:[%s1589_s14 + $0x30] sm:$0xff]  ;;  %v237_v16 = vld [vmem:[%s1589_s14 + $0x38] sm:$0xff]  ;;  %v1470_v42 = vmov 16.0   ;;  %s1199_s29 = sshll.u32 %s1585_s7, 4  ;;  %s1221_s6 = sshll.u32 %s1520_s19, 4 }
  0x2e   : > { %v250_v14 = vpack.c.bf16 %v235_v11, %v235_v11  ;;  %v241_v17 = vld [vmem:[%s2138_s1] sm:$0xff]  ;;  %v260_v18 = vunpack.c.l.b16 %v245_v6  ;;  %v261_v19 = vunpack.c.l.b16 %v246_v7  ;;  %v251_v21 = vpack.c.bf16 %v236_v15, %v236_v15  ;;  %v242_v22 = vld [vmem:[%s2138_s1 + $0x8] sm:$0xff]  ;;  %s1200_s8 = sshll.u32 %s1585_s7, 2  ;;  %s2053_s9 = scalar_lea.hbm %s2141_s4, %s1217_s5 }
  0x2f   : > { %v284_v20 = vunpack.c.l.b16 %v247_v9  ;;  %v238_v23 = vld [vmem:[%s2139_s2] sm:$0xff]  ;;  %v285_v24 = vunpack.c.l.b16 %v248_v12  ;;  %v304_v25 = vunpack.c.l.b16 %v249_v13  ;;  %v252_v27 = vpack.c.bf16 %v237_v16, %v237_v16  ;;  %v239_v39 = vld [vmem:[%s2139_s2 + $0x8] sm:$0xff]  ;;  %s2062_s12 = scalar_lea.hbm %s2140_s3, %s1221_s6  ;;  %s228_s13 = scalar_lea.vmem [#allocation6], %s1200_s8 }
  0x30   : > { %v305_v26 = vunpack.c.l.b16 %v250_v14  ;;  %344 = vperm.xlu0 %1283, %v238_v23   ;;  %517 = vperm.xlu1 %1284, %v238_v23   ;;  %v262_v28 = vpack.c.b16 %v261_v19, %v260_v18  ;;  %v324_v29 = vunpack.c.l.b16 %v251_v21  ;;  %v243_v30 = vpack.c.bf16 %v241_v17, %v241_v17  ;;  %s1085_s20 = sshll.u32 %s228_s13, 4  ;;  %s1087_s22 = sshll.u32 %s2053_s9, 4  ;;  %s1086_s20 = int_to_ptr.vmem [resolvable:$true] %s1085_s20  ;;  %s1088_s22 = int_to_ptr.hbm [resolvable:$true] %s1087_s22 }
  0x31   : > { %v244_v31 = vpack.c.bf16 %v242_v22, %v242_v22  ;;  %533 = vperm.xlu2 %1285, %v238_v23   ;;  %v286_v32 = vpack.c.b16 %v285_v24, %v284_v20  ;;  %v325_v34 = vunpack.c.l.b16 %v252_v27  ;;  %1290 = vrcp.f32 %v1470_v42  ;;  %s2075_s23 = scalar_lea.vmem [#allocation5], %s1199_s29  ;;  %s1056_s30 = scalar_lea.sflag [#allocation7], %s1585_s7 }
  0x32   : > { %v306_v33 = vpack.c.b16 %v305_v26, %v304_v25  ;;  %275 = vmatpush.bf16.msra.mxu0 %v262_v28  ;;  %v255_v35 = vunpack.c.l.b16 %v243_v30  ;;  %vm360_vm1 = vcmask 523264   ;;  %v1471_v22 = vmov 4   ;;  %s1068_s25 = sshll.u32 %s2075_s23, 4  ;;  %s1378_s5 = sshra.s32 %s1088_s22, 4  ;;  %s2085_s25 = int_to_ptr.vmem [resolvable:$true] %s1068_s25  ;;  %s1379_s5 = int_to_ptr.hbm [resolvable:$true] %s1378_s5 }
  0x33   : > { %v256_v36 = vunpack.c.l.b16 %v244_v31  ;;  %295 = vmatpush.bf16.msra.mxu1 %v286_v32  ;;  %v326_v37 = vpack.c.b16 %v325_v34, %v324_v29  ;;  %s1380_s29 = scalar_lea.hbm %s1379_s5, 4  ;;  %s1384_s10 = scalar_lea.hbm %s2141_s4, 8 }
  0x34   : > { %315 = vmatpush.bf16.msra.mxu2 %v306_v33  ;;  %p1381_p6 = scmp.ne.s32.totalorder %s1379_s5, %s1380_s29  ;;  %p1385_p0 = scmp.lt.s32.totalorder %s1379_s5, %s2141_s4 }
  0x35   : > { %v257_v38 = vpack.c.b16 %v256_v36, %v255_v35  ;;  %335 = vmatpush.bf16.msra.mxu3 %v326_v37  ;;  %p1386_p1 = scmp.lt.s32.totalorder %s1384_s10, %s1380_s29 }
  0x36   : > { %p1382_p9 = pnand %p1381_p6, %p1549_p11 }
  0x37   : > { %1201 = vmatmul.msk.bf16.vlgmr.msra.gmra.mxu0 %vm264_vm0, %v257_v38  ;;  %1202 = vmatmul.msk.bf16.vlgmr.msra.gmra.mxu1 %vm264_vm0, %v257_v38  ;;  %v1291_v45 = vpop.eup %1290  ;;  %p1387_p3 = por %p1386_p1, %p1385_p0 }
  0x38   : > { %1203 = vmatmul.msk.bf16.vlgmr.msra.gmra.mxu2 %vm264_vm0, %v257_v38  ;;  %349 = vperm.xlu0 %1283, %v239_v39   ;;  %v398_v46 = vmul.f32 16.0, %v1291_v45  ;;  %vm402_vm2 = vweird.f32 %v1291_v45  ;;  %p1383_p13 = pneg %p1382_p9 }
  0x39   : > { %1204 = vmatmul.msk.bf16.vlgmr.msra.gmra.mxu3 %vm264_vm0, %v257_v38  ;;  %521 = vperm.xlu1 %1284, %v239_v39  }
  0x3a   : > { %537 = vperm.xlu2 %1285, %v239_v39   ;;  %v399_v55 = vsub.f32 1.0, %v398_v46  ;;  %p1388_p4 = pnand %p1387_p3, %p1383_p13 }
  0x3c   : > { %v400_v1 = vmul.f32 %v1291_v45, %v399_v55 }
  0x3e   : > { %v401_v12 = vadd.f32 %v1291_v45, %v400_v1 }
  0x40   : > { %1286 = vset.pattern.permute.xlu0 %v1469_v40  ;;  %v1632_v26 = vsel %vm402_vm2, %v1291_v45, %v401_v12 }
  0x41   : > { %1287 = vset.pattern.permute.xlu1 %v1469_v40  ;;  %901 = vperm.xlu0 %1286, %v238_v23   ;;  %v240_v23 = vld [vmem:[%s2139_s2] sm:$0x1] }
  0x42   : > { %905 = vperm.xlu1 %1287, %v239_v39   ;;  %1288 = vset.pattern.permute.xlu2 %v1471_v22 }
  0x43   : > { %954 = vperm.xlu2 %1288, %v240_v23  }
  0x49   : > { %1289 = vset.pattern.permute.xlu0 %v1471_v22 }
  0xa2   : > { %v345_v41 = vpop.permute.xlu0 %344 }
  0xaa   : > { %v350_v48 = vpop.permute.xlu0 %349 }
  0xb4   : > { %v277_v43 = vpop.f32.mrf.mxu0  ;;  %v297_v44 = vpop.f32.mrf.mxu1 }
  0xb5   : > { %v352_v47 = vadd.f32 %v345_v41, %v277_v43  ;;  %v354_v50 = vadd.f32 %v345_v41, %v297_v44 }
  0xb7   : > { %v361_v57 = vsel %vm360_vm1, %v352_v47, 0.0  ;;  %v370_v59 = vsel %vm360_vm1, %v354_v50, 0.0 }
  0xbb   : > { %v317_v49 = vpop.f32.mrf.mxu2 }
  0xbc   : > { %v337_v51 = vpop.f32.mrf.mxu3  ;;  %v279_v52 = vpop.f32.mrf.mxu0  ;;  %v1619_v63 = vadd.f32 %v345_v41, %v317_v49 }
  0xbd   : > { %v353_v53 = vadd.f32 %v350_v48, %v279_v52  ;;  %v299_v54 = vpop.f32.mrf.mxu1  ;;  %v1621_v2 = vadd.f32 %v345_v41, %v337_v51 }
  0xbe   : > { %v355_v56 = vadd.f32 %v350_v48, %v299_v54  ;;  %v379_v10 = vsel %vm360_vm1, %v1619_v63, 0.0 }
  0xbf   : > { %v362_v58 = vsel %vm360_vm1, %v353_v53, 0.0  ;;  %v388_v14 = vsel %vm360_vm1, %v1621_v2, 0.0 }
  0xc0   : > { %v363_v60 = vadd.f32 %v362_v58, %v361_v57  ;;  %v371_v61 = vsel %vm360_vm1, %v355_v56, 0.0 }
  0xc1   : > { %v372_v62 = vadd.f32 %v371_v61, %v370_v59 }
  0xc2   : > { %v364_v0 = vrot.slane %v363_v60, 4 }
  0xc3   : > { %v373_v3 = vrot.slane %v372_v62, 4  ;;  %v319_v4 = vpop.f32.mrf.mxu2 }
  0xc4   : > { %v365_v5 = vadd.f32 %v364_v0, %v363_v60  ;;  %v357_v6 = vadd.f32 %v350_v48, %v319_v4  ;;  %v339_v7 = vpop.f32.mrf.mxu3 }
  0xc5   : > { %v374_v8 = vadd.f32 %v373_v3, %v372_v62  ;;  %v359_v9 = vadd.f32 %v350_v48, %v339_v7 }
  0xc6   : > { %v366_v11 = vrot.slane %v365_v5, 2  ;;  %v380_v13 = vsel %vm360_vm1, %v357_v6, 0.0 }
  0xc7   : > { %v375_v15 = vrot.slane %v374_v8, 2  ;;  %v381_v16 = vadd.f32 %v380_v13, %v379_v10  ;;  %v389_v17 = vsel %vm360_vm1, %v359_v9, 0.0 }
  0xc8   : > { %v367_v18 = vadd.f32 %v366_v11, %v365_v5  ;;  %v390_v19 = vadd.f32 %v389_v17, %v388_v14 }
  0xc9   : > { %v376_v20 = vadd.f32 %v375_v15, %v374_v8  ;;  %v382_v21 = vrot.slane %v381_v16, 4 }
  0xca   : > { %v368_v24 = vrot.slane %v367_v18, 1  ;;  %v391_v25 = vrot.slane %v390_v19, 4 }
  0xcb   : > { %v377_v27 = vrot.slane %v376_v20, 1  ;;  %v383_v28 = vadd.f32 %v382_v21, %v381_v16 }
  0xcc   : > { %v369_v29 = vadd.f32 %v368_v24, %v367_v18  ;;  %v392_v30 = vadd.f32 %v391_v25, %v390_v19 }
  0xcd   : > { %v378_v31 = vadd.f32 %v377_v27, %v376_v20  ;;  %v384_v32 = vrot.slane %v383_v28, 2 }
  0xce   : > { %v404_v33 = vmul.f32 %v1632_v26, %v369_v29  ;;  %v393_v34 = vrot.slane %v392_v30, 2 }
  0xcf   : > { %v405_v35 = vmul.f32 %v1632_v26, %v378_v31  ;;  %v385_v36 = vadd.f32 %v384_v32, %v383_v28 }
  0xd0   : > { %v1636_v37 = vsub.f32 %v352_v47, %v404_v33  ;;  %v1638_v38 = vsub.f32 %v353_v53, %v404_v33  ;;  %v394_v39 = vadd.f32 %v393_v34, %v392_v30 }
  0xd1   : > { %v1640_v40 = vsub.f32 %v354_v50, %v405_v35  ;;  %v1642_v41 = vsub.f32 %v355_v56, %v405_v35  ;;  %v386_v42 = vrot.slane %v385_v36, 1 }
  0xd2   : > { %v416_v43 = vmul.f32 %v1636_v37, %v1636_v37  ;;  %v417_v44 = vmul.f32 %v1638_v38, %v1638_v38  ;;  %v395_v45 = vrot.slane %v394_v39, 1 }
  0xd3   : > { %v418_v46 = vmul.f32 %v1640_v40, %v1640_v40  ;;  %v419_v47 = vmul.f32 %v1642_v41, %v1642_v41  ;;  %v387_v48 = vadd.f32 %v386_v42, %v385_v36 }
  0xd4   : > { %v424_v49 = vsel %vm360_vm1, %v416_v43, 0.0  ;;  %v425_v50 = vsel %vm360_vm1, %v417_v44, 0.0  ;;  %v396_v51 = vadd.f32 %v395_v45, %v394_v39 }
  0xd5   : > { %v426_v52 = vadd.f32 %v425_v50, %v424_v49  ;;  %v433_v53 = vsel %vm360_vm1, %v418_v46, 0.0  ;;  %v434_v54 = vsel %vm360_vm1, %v419_v47, 0.0  ;;  %v406_v55 = vmul.f32 %v1632_v26, %v387_v48  ;;  %v1684_v50 = vpop.permute.xlu1 %517 }
  0xd6   : > { %v435_v56 = vadd.f32 %v434_v54, %v433_v53  ;;  %v407_v57 = vmul.f32 %v1632_v26, %v396_v51  ;;  %v1686_v53 = vpop.permute.xlu2 %533 }
  0xd7   : > { %v427_v58 = vrot.slane %v426_v52, 4  ;;  %v1659_v59 = vsub.f32 %v1619_v63, %v406_v55  ;;  %v1661_v60 = vsub.f32 %v357_v6, %v406_v55 }
  0xd8   : > { %v436_v61 = vrot.slane %v435_v56, 4  ;;  %v1664_v62 = vsub.f32 %v1621_v2, %v407_v57  ;;  %v1666_v0 = vsub.f32 %v359_v9, %v407_v57 }
  0xd9   : > { %v428_v1 = vadd.f32 %v427_v58, %v426_v52  ;;  %v420_v3 = vmul.f32 %v1659_v59, %v1659_v59  ;;  %v421_v4 = vmul.f32 %v1661_v60, %v1661_v60 }
  0xda   : > { %v437_v5 = vadd.f32 %v436_v61, %v435_v56  ;;  %v422_v63 = vmul.f32 %v1664_v62, %v1664_v62  ;;  %v423_v6 = vmul.f32 %v1666_v0, %v1666_v0 }
  0xdb   : > { %v429_v7 = vrot.slane %v428_v1, 2  ;;  %v442_v2 = vsel %vm360_vm1, %v420_v3, 0.0  ;;  %v443_v8 = vsel %vm360_vm1, %v421_v4, 0.0 }
  0xdc   : > { %v438_v9 = vrot.slane %v437_v5, 2  ;;  %v444_v10 = vadd.f32 %v443_v8, %v442_v2  ;;  %v451_v11 = vsel %vm360_vm1, %v422_v63, 0.0  ;;  %v452_v12 = vsel %vm360_vm1, %v423_v6, 0.0 }
  0xdd   : > { %v430_v13 = vadd.f32 %v429_v7, %v428_v1  ;;  %v453_v14 = vadd.f32 %v452_v12, %v451_v11  ;;  %v522_v12 = vpop.permute.xlu1 %521 }
  0xde   : > { %v439_v15 = vadd.f32 %v438_v9, %v437_v5  ;;  %v445_v16 = vrot.slane %v444_v10, 4 }
  0xdf   : > { %v431_v17 = vrot.slane %v430_v13, 1  ;;  %v454_v18 = vrot.slane %v453_v14, 4 }
  0xe0   : > { %v440_v19 = vrot.slane %v439_v15, 1  ;;  %v446_v20 = vadd.f32 %v445_v16, %v444_v10 }
  0xe1   : > { %v432_v21 = vadd.f32 %v431_v17, %v430_v13  ;;  %v455_v22 = vadd.f32 %v454_v18, %v453_v14  ;;  %v538_v18 = vpop.permute.xlu2 %537 }
  0xe2   : > { %v441_v23 = vadd.f32 %v440_v19, %v439_v15  ;;  %v447_v24 = vrot.slane %v446_v20, 2 }
  0xe3   : > { %v460_v25 = vmul.f32 %v432_v21, %v1632_v26  ;;  %v456_v27 = vrot.slane %v455_v22, 2 }
  0xe4   : > { %v461_v28 = vmul.f32 %v441_v23, %v1632_v26  ;;  %v448_v29 = vadd.f32 %v447_v24, %v446_v20 }
  0xe5   : > { %v464_v30 = vadd.f32 1e-05, %v460_v25  ;;  %v457_v31 = vadd.f32 %v456_v27, %v455_v22 }
  0xe6   : > { %v465_v32 = vadd.f32 1e-05, %v461_v28  ;;  %v449_v33 = vrot.slane %v448_v29, 1 }
  0xe7   : > { %1292 = vrsqrt.f32 %v464_v30  ;;  %v458_v34 = vrot.slane %v457_v31, 1  ;;  %vm474_vm5 = vweird.f32 %v464_v30 }
  0xe8   : > { %1294 = vrsqrt.f32 %v465_v32  ;;  %v450_v35 = vadd.f32 %v449_v33, %v448_v29  ;;  %vm484_vm7 = vweird.f32 %v465_v32 }
  0xe9   : > { %v459_v36 = vadd.f32 %v458_v34, %v457_v31 }
  0xea   : > { %v462_v39 = vmul.f32 %v450_v35, %v1632_v26 }
  0xeb   : > { %v463_v42 = vmul.f32 %v459_v36, %v1632_v26 }
  0xec   : > { %v466_v43 = vadd.f32 1e-05, %v462_v39 }
  0xed   : > { %v1293_v44 = vpop.eup %1292  ;;  %v467_v45 = vadd.f32 1e-05, %v463_v42 }
  0xee   : > { %v1295_v46 = vpop.eup %1294  ;;  %v469_v47 = vmul.f32 %v1293_v44, %v464_v30  ;;  %1296 = vrsqrt.f32 %v466_v43  ;;  %vm475_vm3 = vweird.f32 %v1293_v44  ;;  %vm494_vm11 = vweird.f32 %v466_v43 }
  0xef   : > { %v479_v48 = vmul.f32 %v1295_v46, %v465_v32  ;;  %1298 = vrsqrt.f32 %v467_v45  ;;  %vm485_vm4 = vweird.f32 %v1295_v46  ;;  %vm476_vm6 = vmor %vm474_vm5, %vm475_vm3  ;;  %vm504_vm13 = vweird.f32 %v467_v45 }
  0xf0   : > { %v470_v49 = vmul.f32 %v1293_v44, %v469_v47  ;;  %vm486_vm8 = vmor %vm484_vm7, %vm485_vm4 }
  0xf1   : > { %v480_v51 = vmul.f32 %v1295_v46, %v479_v48 }
  0xf2   : > { %v471_v52 = vmul.f32 0.5, %v470_v49 }
  0xf3   : > { %v481_v54 = vmul.f32 0.5, %v480_v51 }
  0xf4   : > { %v1297_v55 = vpop.eup %1296  ;;  %v472_v56 = vsub.f32 1.5, %v471_v52 }
  0xf5   : > { %v1299_v26 = vpop.eup %1298  ;;  %v482_v57 = vsub.f32 1.5, %v481_v54  ;;  %v489_v58 = vmul.f32 %v1297_v55, %v466_v43  ;;  %vm495_vm9 = vweird.f32 %v1297_v55 }
  0xf6   : > { %v473_v61 = vmul.f32 %v1293_v44, %v472_v56  ;;  %v499_v1 = vmul.f32 %v1299_v26, %v467_v45  ;;  %vm505_vm10 = vweird.f32 %v1299_v26  ;;  %vm496_vm12 = vmor %vm494_vm11, %vm495_vm9 }
  0xf7   : > { %v483_v3 = vmul.f32 %v1295_v46, %v482_v57  ;;  %v490_v4 = vmul.f32 %v1297_v55, %v489_v58  ;;  %vm506_vm14 = vmor %vm504_vm13, %vm505_vm10 }
  0xf8   : > { %v477_v5 = vsel %vm476_vm6, %v1293_v44, %v473_v61  ;;  %v500_v63 = vmul.f32 %v1299_v26, %v499_v1 }
  0xf9   : > { %v508_v6 = vmul.f32 %v477_v5, %v1636_v37  ;;  %v509_v7 = vmul.f32 %v477_v5, %v1638_v38  ;;  %v487_v2 = vsel %vm486_vm8, %v1295_v46, %v483_v3  ;;  %v491_v8 = vmul.f32 0.5, %v490_v4 }
  0xfa   : > { %v510_v9 = vmul.f32 %v487_v2, %v1640_v40  ;;  %v511_v10 = vmul.f32 %v487_v2, %v1642_v41  ;;  %v501_v11 = vmul.f32 0.5, %v500_v63 }
  0xfb   : > { %v492_v13 = vsub.f32 1.5, %v491_v8  ;;  %v524_v14 = vmul.f32 %v1684_v50, %v508_v6  ;;  %v525_v15 = vmul.f32 %v522_v12, %v509_v7 }
  0xfc   : > { %v502_v16 = vsub.f32 1.5, %v501_v11  ;;  %v526_v17 = vmul.f32 %v1684_v50, %v510_v9  ;;  %v527_v37 = vmul.f32 %v522_v12, %v511_v10 }
  0xfd   : > { %v493_v38 = vmul.f32 %v1297_v55, %v492_v13  ;;  %v1695_v19 = vadd.f32 %v1686_v53, %v524_v14  ;;  %v1697_v40 = vadd.f32 %v538_v18, %v525_v15 }
  0xfe   : > { %v503_v41 = vmul.f32 %v1299_v26, %v502_v16  ;;  %v1700_v20 = vadd.f32 %v1686_v53, %v526_v17  ;;  %v1702_v21 = vadd.f32 %v538_v18, %v527_v37 }
  0xff   : > { %v497_v22 = vsel %vm496_vm12, %v1297_v55, %v493_v38  ;;  %v1705_v23 = vmul.f32 0.70710677, %v1695_v19  ;;  %v1708_v24 = vmul.f32 0.70710677, %v1697_v40 }
 0x100   : > { %v512_v25 = vmul.f32 %v497_v22, %v1659_v59  ;;  %v513_v27 = vmul.f32 %v497_v22, %v1661_v60  ;;  %v507_v28 = vsel %vm506_vm14, %v1299_v26, %v503_v41  ;;  %v1713_v29 = vmul.f32 0.70710677, %v1700_v20 }
 0x101   : > { %v514_v30 = vmul.f32 %v507_v28, %v1664_v62  ;;  %v515_v31 = vmul.f32 %v507_v28, %v1666_v0  ;;  %v564_v32 = vmul.f32 %v1705_v23, %v1705_v23  ;;  %v1720_v33 = vmul.f32 0.70710677, %v1702_v21 }
 0x102   : > { %v528_v34 = vmul.f32 %v1684_v50, %v512_v25  ;;  %v644_v59 = vmul.f32 %v1713_v29, %v1713_v29  ;;  %v529_v60 = vmul.f32 %v522_v12, %v513_v27  ;;  %v604_v35 = vmul.f32 %v1708_v24, %v1708_v24 }
 0x103   : > { %v530_v36 = vmul.f32 %v1684_v50, %v514_v30  ;;  %v1728_v62 = vmin.f32 %v564_v32, 16.0  ;;  %v531_v0 = vmul.f32 %v522_v12, %v515_v31  ;;  %v684_v39 = vmul.f32 %v1720_v33, %v1720_v33 }
 0x104   : > { %v1733_v42 = vadd.f32 %v1686_v53, %v528_v34  ;;  %v1735_v43 = vmin.f32 %v644_v59, 16.0  ;;  %v1737_v44 = vadd.f32 %v538_v18, %v529_v60  ;;  %v1739_v45 = vmin.f32 %v604_v35, 16.0 }
 0x105   : > { %v1742_v46 = vadd.f32 %v1686_v53, %v530_v36  ;;  %v566_v47 = vmul.f32 2.1237322e-06, %v1728_v62  ;;  %v1745_v48 = vadd.f32 %v538_v18, %v531_v0  ;;  %v1747_v49 = vmin.f32 %v684_v39, 16.0 }
 0x106   : > { %v1750_v50 = vmul.f32 0.70710677, %v1733_v42  ;;  %v646_v51 = vmul.f32 2.1237322e-06, %v1735_v43  ;;  %v1754_v52 = vmul.f32 0.70710677, %v1737_v44 }
 0x107   : > { %v1757_v54 = vmul.f32 0.70710677, %v1742_v46  ;;  %v567_v55 = vadd.f32 0.00028619796, %v566_v47  ;;  %v1760_v53 = vmul.f32 0.70710677, %v1745_v48 }
 0x108   : > { %v647_v56 = vadd.f32 0.00028619796, %v646_v51  ;;  %v724_v26 = vmul.f32 %v1750_v50, %v1750_v50  ;;  %v606_v57 = vmul.f32 2.1237322e-06, %v1739_v45  ;;  %v686_v58 = vmul.f32 2.1237322e-06, %v1747_v49 }
 0x109   : > { %v568_v61 = vmul.f32 %v567_v55, %v1728_v62  ;;  %v804_v1 = vmul.f32 %v1757_v54, %v1757_v54  ;;  %v764_v3 = vmul.f32 %v1754_v52, %v1754_v52  ;;  %v844_v4 = vmul.f32 %v1760_v53, %v1760_v53 }
 0x10a   : > { %v648_v5 = vmul.f32 %v647_v56, %v1735_v43  ;;  %v1774_v63 = vmin.f32 %v724_v26, 16.0  ;;  %v607_v6 = vadd.f32 0.00028619796, %v606_v57  ;;  %v687_v7 = vadd.f32 0.00028619796, %v686_v58 }
 0x10b   : > { %v569_v2 = vadd.f32 0.0036580483, %v568_v61  ;;  %v1776_v8 = vmin.f32 %v804_v1, 16.0  ;;  %v1778_v9 = vmin.f32 %v764_v3, 16.0  ;;  %v1785_v16 = vmin.f32 %v844_v4, 16.0 }
 0x10c   : > { %v726_v10 = vmul.f32 2.1237322e-06, %v1774_v63  ;;  %v608_v11 = vmul.f32 %v607_v6, %v1739_v45  ;;  %v649_v12 = vadd.f32 0.0036580483, %v648_v5  ;;  %v688_v13 = vmul.f32 %v687_v7, %v1747_v49 }
 0x10d   : > { %v766_v14 = vmul.f32 2.1237322e-06, %v1778_v9  ;;  %v570_v15 = vmul.f32 %v569_v2, %v1728_v62  ;;  %v806_v37 = vmul.f32 2.1237322e-06, %v1776_v8  ;;  %v846_v27 = vmul.f32 2.1237322e-06, %v1785_v16 }
 0x10e   : > { %v727_v17 = vadd.f32 0.00028619796, %v726_v10  ;;  %v609_v18 = vadd.f32 0.0036580483, %v608_v11  ;;  %v650_v38 = vmul.f32 %v649_v12, %v1735_v43  ;;  %v689_v41 = vadd.f32 0.0036580483, %v688_v13 }
 0x10f   : > { %v767_v22 = vadd.f32 0.00028619796, %v766_v14  ;;  %v571_v25 = vadd.f32 0.05243302, %v570_v15  ;;  %v807_v30 = vadd.f32 0.00028619796, %v806_v37 }
 0x110   : > { %v728_v28 = vmul.f32 %v727_v17, %v1774_v63  ;;  %v610_v31 = vmul.f32 %v609_v18, %v1739_v45  ;;  %v651_v32 = vadd.f32 0.05243302, %v650_v38  ;;  %v690_v34 = vmul.f32 %v689_v41, %v1747_v49 }
 0x111   : > { %v768_v59 = vmul.f32 %v767_v22, %v1778_v9  ;;  %v572_v60 = vmul.f32 %v571_v25, %v1728_v62  ;;  %v847_v35 = vadd.f32 0.00028619796, %v846_v27  ;;  %v808_v0 = vmul.f32 %v807_v30, %v1776_v8 }
 0x112   : > { %v729_v36 = vadd.f32 0.0036580483, %v728_v28  ;;  %v611_v39 = vadd.f32 0.05243302, %v610_v31  ;;  %v652_v47 = vmul.f32 %v651_v32, %v1735_v43  ;;  %v691_v51 = vadd.f32 0.05243302, %v690_v34 }
 0x113   : > { %v769_v55 = vadd.f32 0.0036580483, %v768_v59  ;;  %v573_v56 = vadd.f32 0.18741608, %v572_v60  ;;  %v848_v26 = vmul.f32 %v847_v35, %v1785_v16  ;;  %v809_v58 = vadd.f32 0.0036580483, %v808_v0 }
 0x114   : > { %v730_v57 = vmul.f32 %v729_v36, %v1774_v63  ;;  %v612_v61 = vmul.f32 %v611_v39, %v1739_v45  ;;  %v653_v1 = vadd.f32 0.18741608, %v652_v47  ;;  %v692_v3 = vmul.f32 %v691_v51, %v1747_v49 }
 0x115   : > { %v770_v4 = vmul.f32 %v769_v55, %v1778_v9  ;;  %v574_v5 = vmul.f32 %v573_v56, %v1728_v62  ;;  %v849_v6 = vadd.f32 0.0036580483, %v848_v26  ;;  %v617_v7 = vmul.f32 3.8918573e-05, %v1739_v45 }
 0x116   : > { %v697_v2 = vmul.f32 3.8918573e-05, %v1747_v49  ;;  %v731_v10 = vadd.f32 0.05243302, %v730_v57  ;;  %v810_v11 = vmul.f32 %v809_v58, %v1776_v8  ;;  %v613_v12 = vadd.f32 0.18741608, %v612_v61 }
 0x117   : > { %v777_v13 = vmul.f32 3.8918573e-05, %v1778_v9  ;;  %v618_v14 = vadd.f32 0.001143296, %v617_v7  ;;  %v857_v17 = vmul.f32 3.8918573e-05, %v1785_v16  ;;  %v1809_v37 = vmul.f32 %v653_v1, %v1735_v43 }
 0x118   : > { %v698_v15 = vadd.f32 0.001143296, %v697_v2  ;;  %v693_v18 = vadd.f32 0.18741608, %v692_v3  ;;  %v771_v38 = vadd.f32 0.05243302, %v770_v4  ;;  %v1816_v30 = vmul.f32 %v731_v10, %v1774_v63 }
 0x119   : > { %v778_v41 = vadd.f32 0.001143296, %v777_v13  ;;  %v1811_v22 = vadd.f32 1.1283791, %v574_v5  ;;  %v619_v25 = vmul.f32 %v618_v14, %v1739_v45  ;;  %v858_v28 = vadd.f32 0.001143296, %v857_v17 }
 0x11a   : > { %v699_v27 = vmul.f32 %v698_v15, %v1747_v49  ;;  %v811_v31 = vadd.f32 0.05243302, %v810_v11  ;;  %v850_v32 = vmul.f32 %v849_v6, %v1785_v16  ;;  %v614_v59 = vmul.f32 %v613_v12, %v1739_v45 }
 0x11b   : > { %v779_v34 = vmul.f32 %v778_v41, %v1778_v9  ;;  %v620_v60 = vadd.f32 0.014752088, %v619_v25  ;;  %v859_v36 = vmul.f32 %v858_v28, %v1785_v16  ;;  %v772_v0 = vmul.f32 %v771_v38, %v1778_v9 }
 0x11c   : > { %v700_v35 = vadd.f32 0.014752088, %v699_v27  ;;  %v577_v47 = vmul.f32 3.8918573e-05, %v1728_v62  ;;  %v657_v51 = vmul.f32 3.8918573e-05, %v1735_v43 }
 0x11d   : > { %v780_v39 = vadd.f32 0.014752088, %v779_v34  ;;  %v621_v55 = vmul.f32 %v620_v60, %v1739_v45  ;;  %v860_v26 = vadd.f32 0.014752088, %v859_v36  ;;  %v737_v57 = vmul.f32 3.8918573e-05, %v1774_v63 }
 0x11e   : > { %v701_v56 = vmul.f32 %v700_v35, %v1747_v49  ;;  %v578_v61 = vadd.f32 0.001143296, %v577_v47  ;;  %v658_v1 = vadd.f32 0.001143296, %v657_v51  ;;  %v817_v3 = vmul.f32 3.8918573e-05, %v1776_v8 }
 0x11f   : > { %v781_v58 = vmul.f32 %v780_v39, %v1778_v9  ;;  %v622_v4 = vadd.f32 0.112945676, %v621_v55  ;;  %v861_v6 = vmul.f32 %v860_v26, %v1785_v16  ;;  %v738_v7 = vadd.f32 0.001143296, %v737_v57 }
 0x120   : > { %v702_v5 = vadd.f32 0.112945676, %v701_v56  ;;  %v579_v10 = vmul.f32 %v578_v61, %v1728_v62  ;;  %v659_v11 = vmul.f32 %v658_v1, %v1735_v43  ;;  %v818_v12 = vadd.f32 0.001143296, %v817_v3 }
 0x121   : > { %v782_v2 = vadd.f32 0.112945676, %v781_v58  ;;  %v851_v13 = vadd.f32 0.05243302, %v850_v32  ;;  %v623_v14 = vmul.f32 %v622_v4, %v1739_v45  ;;  %v862_v17 = vadd.f32 0.112945676, %v861_v6 }
 0x122   : > { %v703_v15 = vmul.f32 %v702_v5, %v1747_v49  ;;  %v773_v38 = vadd.f32 0.18741608, %v772_v0  ;;  %v580_v25 = vadd.f32 0.014752088, %v579_v10  ;;  %v660_v27 = vadd.f32 0.014752088, %v659_v11 }
 0x123   : > { %v783_v41 = vmul.f32 %v782_v2, %v1778_v9  ;;  %v624_v28 = vadd.f32 0.4994258, %v623_v14  ;;  %v863_v60 = vmul.f32 %v862_v17, %v1785_v16  ;;  %v739_v35 = vmul.f32 %v738_v7, %v1774_v63 }
 0x124   : > { %v704_v34 = vadd.f32 0.4994258, %v703_v15  ;;  %v581_v39 = vmul.f32 %v580_v25, %v1728_v62  ;;  %v661_v32 = vmul.f32 %v660_v27, %v1735_v43  ;;  %v819_v47 = vmul.f32 %v818_v12, %v1776_v8 }
 0x125   : > { %v784_v36 = vadd.f32 0.4994258, %v783_v41  ;;  %v694_v51 = vmul.f32 %v693_v18, %v1747_v49  ;;  %v625_v0 = vmul.f32 %v624_v28, %v1739_v45  ;;  %v864_v56 = vadd.f32 0.4994258, %v863_v60 }
 0x126   : > { %v705_v55 = vmul.f32 %v704_v34, %v1747_v49  ;;  %v852_v26 = vmul.f32 %v851_v13, %v1785_v16  ;;  %v582_v58 = vadd.f32 0.112945676, %v581_v39  ;;  %v662_v61 = vadd.f32 0.112945676, %v661_v32 }
 0x127   : > { %v785_v57 = vmul.f32 %v784_v36, %v1778_v9  ;;  %v774_v1 = vmul.f32 %v773_v38, %v1778_v9  ;;  %v1847_v3 = vadd.f32 1.0, %v625_v0  ;;  %v740_v5 = vadd.f32 0.014752088, %v739_v35 }
 0x128   : > { %v1849_v4 = vadd.f32 1.0, %v705_v55  ;;  %v655_v18 = vadd.f32 1.1283791, %v1809_v37  ;;  %v812_v45 = vmul.f32 %v811_v31, %v1776_v8  ;;  %v820_v49 = vadd.f32 0.014752088, %v819_v47 }
 0x129   : > { %v1853_v6 = vadd.f32 1.0, %v785_v57  ;;  %1300 = vrcp.f32 %v1847_v3  ;;  %v865_v7 = vmul.f32 %v864_v56, %v1785_v16  ;;  %v583_v2 = vmul.f32 %v582_v58, %v1728_v62 }
 0x12a   : > { %v663_v9 = vmul.f32 %v662_v61, %v1735_v43  ;;  %v733_v10 = vadd.f32 0.18741608, %v1816_v30  ;;  %v615_v11 = vadd.f32 1.1283791, %v614_v59  ;;  %v695_v12 = vadd.f32 1.1283791, %v694_v51 }
 0x12b   : > { %1302 = vrcp.f32 %v1849_v4  ;;  %v775_v37 = vadd.f32 1.1283791, %v774_v1  ;;  %v853_v13 = vadd.f32 0.18741608, %v852_v26  ;;  %v741_v31 = vmul.f32 %v740_v5, %v1774_v63 }
 0x12c   : > { %1304 = vrcp.f32 %v1853_v6  ;;  %v1865_v14 = vmul.f32 %v1811_v22, %v1705_v23  ;;  %v1867_v15 = vadd.f32 0.18741608, %v812_v45  ;;  %v1870_v17 = vmul.f32 0.5, %v1697_v40 }
 0x12d   : > { %v821_v30 = vmul.f32 %v820_v49, %v1776_v8  ;;  %v1874_v59 = vmul.f32 %v655_v18, %v1713_v29  ;;  %v1876_v38 = vadd.f32 1.0, %v865_v7  ;;  %v584_v41 = vadd.f32 0.4994258, %v583_v2 }
 0x12e   : > { %v664_v25 = vadd.f32 0.4994258, %v663_v9  ;;  %v1879_v27 = vmul.f32 %v733_v10, %v1774_v63  ;;  %v1882_v23 = vmul.f32 %v615_v11, %v1708_v24  ;;  %v1885_v22 = vmul.f32 %v695_v12, %v1720_v33 }
 0x12f   : > { %v1888_v40 = vmul.f32 0.5, %v1702_v21  ;;  %v1301_v28 = vpop.eup %1300  ;;  %v1891_v29 = vmul.f32 %v775_v37, %v1754_v52  ;;  %v1894_v34 = vmul.f32 %v853_v13, %v1785_v16  ;;  %1306 = vrcp.f32 %v1876_v38 }
 0x130   : > { %v742_v60 = vadd.f32 0.112945676, %v741_v31  ;;  %v628_v24 = vmul.f32 %v1301_v28, %v1847_v3  ;;  %v585_v36 = vmul.f32 %v584_v41, %v1728_v62  ;;  %v665_v33 = vmul.f32 %v664_v25, %v1735_v43 }
 0x131   : > { %v1303_v35 = vpop.eup %1302  ;;  %v822_v39 = vadd.f32 0.112945676, %v821_v30  ;;  %vm632_vm15 = vweird.f32 %v1847_v3  ;;  %v636_v52 = vand.u32 2147483647, %v1847_v3  ;;  %v638_v16 = vand.u32 2147483648, %v1847_v3 }
 0x132   : > { %v1900_v21 = vpop.eup %1304  ;;  %v708_v32 = vmul.f32 %v1303_v35, %v1849_v4  ;;  %v629_v47 = vsub.f32 1.0, %v628_v24  ;;  %vm712_vm0 = vweird.f32 %v1849_v4  ;;  %v1909_v62 = vadd.f32 1.0, %v585_v36 }
 0x133   : > { %v788_v51 = vmul.f32 %v1900_v21, %v1853_v6  ;;  %v716_v0 = vand.u32 2147483647, %v1849_v4  ;;  %v718_v55 = vand.u32 2147483648, %v1849_v4  ;;  %v1913_v56 = vadd.f32 1.0, %v665_v33 }
 0x134   : > { %v709_v43 = vsub.f32 1.0, %v708_v32  ;;  %v630_v26 = vmul.f32 %v1301_v28, %v629_v47  ;;  %vm633_vm2 = vweird.f32 %v1301_v28  ;;  %1308 = vrcp.f32 %v1909_v62 }
 0x135   : > { %v789_v57 = vsub.f32 1.0, %v788_v51  ;;  %v1916_v58 = vpop.eup %1306  ;;  %vm713_vm3 = vweird.f32 %v1303_v35  ;;  %1310 = vrcp.f32 %v1913_v56  ;;  %v743_v1 = vmul.f32 %v742_v60, %v1774_v63  ;;  %vm634_vm5 = vmor %vm632_vm15, %vm633_vm2 }
 0x136   : > { %v710_v61 = vmul.f32 %v1303_v35, %v709_v43  ;;  %v631_v5 = vadd.f32 %v1301_v28, %v630_v26  ;;  %vm637_vm4 = vcmp.eq.f32.partialorder %v636_v52, 8.507059e+37  ;;  %v796_v18 = vand.u32 2147483647, %v1853_v6  ;;  %vm714_vm6 = vmor %vm712_vm0, %vm713_vm3 }
 0x137   : > { %v798_v45 = vand.u32 2147483648, %v1853_v6  ;;  %v639_v49 = vor.u32 1.1754944e-38, %v638_v16  ;;  %v790_v2 = vmul.f32 %v1900_v21, %v789_v57  ;;  %v868_v9 = vmul.f32 %v1916_v58, %v1876_v38 }
 0x138   : > { %v711_v7 = vadd.f32 %v1303_v35, %v710_v61  ;;  %v635_v10 = vsel %vm634_vm5, %v1301_v28, %v631_v5  ;;  %vm717_vm7 = vcmp.eq.f32.partialorder %v716_v0, 8.507059e+37  ;;  %v719_v11 = vor.u32 1.1754944e-38, %v718_v55 }
 0x139   : > { %vm792_vm8 = vweird.f32 %v1853_v6  ;;  %v640_v12 = vsel %vm637_vm4, %v639_v49, %v635_v10  ;;  %v744_v13 = vadd.f32 0.4994258, %v743_v1  ;;  %v823_v3 = vmul.f32 %v822_v39, %v1776_v8 }
 0x13a   : > { %v715_v37 = vsel %vm714_vm6, %v1303_v35, %v711_v7  ;;  %v1309_v31 = vpop.eup %1308  ;;  %vm1931_vm9 = vcmp.eq.f32.partialorder %v796_v18, 8.507059e+37  ;;  %v799_v25 = vor.u32 1.1754944e-38, %v798_v45  ;;  %v596_v28 = vand.u32 2147483647, %v1909_v62 }
 0x13b   : > { %v720_v30 = vsel %vm717_vm7, %v719_v11, %v715_v37  ;;  %v1311_v4 = vpop.eup %1310  ;;  %v791_v60 = vadd.f32 %v1900_v21, %v790_v2  ;;  %vm793_vm10 = vweird.f32 %v1900_v21  ;;  %v869_v24 = vsub.f32 1.0, %v868_v9 }
 0x13c   : > { %v588_v35 = vmul.f32 %v1309_v31, %v1909_v62  ;;  %v641_v36 = vmul.f32 %v640_v12, %v1882_v23  ;;  %v721_v33 = vmul.f32 %v720_v30, %v1885_v22  ;;  %v878_v39 = vand.u32 2147483648, %v1876_v38  ;;  %vm1948_vm13 = vmor %vm792_vm8, %vm793_vm10 }
 0x13d   : > { %v668_v52 = vmul.f32 %v1311_v4, %v1913_v56  ;;  %vm872_vm11 = vweird.f32 %v1876_v38  ;;  %vm592_vm12 = vweird.f32 %v1909_v62  ;;  %v745_v32 = vmul.f32 %v744_v13, %v1774_v63 }
 0x13e   : > { %v589_v16 = vsub.f32 1.0, %v588_v35  ;;  %v824_v47 = vadd.f32 0.4994258, %v823_v3  ;;  %vm873_vm14 = vweird.f32 %v1916_v58  ;;  %vm1953_vm15 = vcmp.eq.f32.partialorder %v596_v28, 8.507059e+37 }
 0x13f   : > { %v598_v22 = vand.u32 2147483648, %v1909_v62  ;;  %v669_v43 = vsub.f32 1.0, %v668_v52  ;;  %v795_v63 = vsel %vm1948_vm13, %v1900_v21, %v791_v60  ;;  %v870_v0 = vmul.f32 %v1916_v58, %v869_v24  ;;  %vm1986_vm7 = vmor %vm872_vm11, %vm873_vm14 }
 0x140   : > { %v590_v6 = vmul.f32 %v1309_v31, %v589_v16  ;;  %vm593_vm0 = vweird.f32 %v1309_v31  ;;  %v1206_v55 = vclamps-f32 %v641_v36, 1.0  ;;  %v1208_v26 = vclamps-f32 %v721_v33, 1.0  ;;  %v2001_v36 = vpop.permute.xlu1 %905 }
 0x141   : > { %v670_v57 = vmul.f32 %v1311_v4, %v669_v43  ;;  %v678_v61 = vand.u32 2147483648, %v1913_v56  ;;  %vm673_vm2 = vweird.f32 %v1311_v4  ;;  %v676_v5 = vand.u32 2147483647, %v1913_v56  ;;  %vm594_vm3 = vmor %vm592_vm12, %vm593_vm0 }
 0x142   : > { %v591_v1 = vadd.f32 %v1309_v31, %v590_v6  ;;  %v1964_v18 = vadd.f32 1.0, %v745_v32  ;;  %v800_v45 = vsel %vm1931_vm9, %v799_v25, %v795_v63  ;;  %v599_v21 = vor.u32 1.1754944e-38, %v598_v22 }
 0x143   : > { %v671_v49 = vadd.f32 %v1311_v4, %v670_v57  ;;  %vm672_vm4 = vweird.f32 %v1913_v56  ;;  %v871_v7 = vadd.f32 %v1916_v58, %v870_v0  ;;  %v825_v9 = vmul.f32 %v824_v47, %v1776_v8  ;;  %v2010_v47 = vpop.permute.xlu0 %901 }
 0x144   : > { %v595_v2 = vsel %vm594_vm3, %v1309_v31, %v591_v1  ;;  %1312 = vrcp.f32 %v1964_v18  ;;  %v885_v10 = vadd.f32 1.0, %v1206_v55  ;;  %v887_v11 = vadd.f32 1.0, %v1208_v26  ;;  %vm674_vm5 = vmor %vm672_vm4, %vm673_vm2 }
 0x145   : > { %v600_v12 = vsel %vm1953_vm15, %v599_v21, %v595_v2  ;;  %v679_v62 = vor.u32 1.1754944e-38, %v678_v61  ;;  %v876_v37 = vand.u32 2147483647, %v1876_v38  ;;  %v675_v56 = vsel %vm674_vm5, %v1311_v4, %v671_v49 }
 0x146   : > { %v601_v13 = vmul.f32 %v600_v12, %v1865_v14  ;;  %vm677_vm6 = vcmp.eq.f32.partialorder %v676_v5, 8.507059e+37  ;;  %v855_v3 = vadd.f32 1.1283791, %v1894_v34  ;;  %v553_v31 = vmul.f32 0.5, %v1737_v44 }
 0x147   : > { %v801_v30 = vmul.f32 %v800_v45, %v1891_v29  ;;  %v680_v25 = vsel %vm677_vm6, %v679_v62, %v675_v56  ;;  %v875_v14 = vsel %vm1986_vm7, %v1916_v58, %v871_v7  ;;  %v1994_v4 = vadd.f32 1.0, %v825_v9 }
 0x148   : > { %v1205_v28 = vclamps-f32 %v601_v13, 1.0  ;;  %v681_v34 = vmul.f32 %v680_v25, %v1874_v59  ;;  %v814_v44 = vmul.f32 %v1867_v15, %v1776_v8  ;;  %v879_v29 = vor.u32 1.1754944e-38, %v878_v39 }
 0x149   : > { %v893_v38 = vmul.f32 %v885_v10, %v1870_v17  ;;  %v895_v60 = vmul.f32 %v887_v11, %v1888_v40  ;;  %v735_v35 = vadd.f32 1.1283791, %v1879_v27  ;;  %vm877_vm8 = vcmp.eq.f32.partialorder %v876_v37, 8.507059e+37 }
 0x14a   : > { %v1313_v24 = vpop.eup %1312  ;;  %v1207_v58 = vclamps-f32 %v681_v34, 1.0  ;;  %1314 = vrcp.f32 %v1994_v4  ;;  %v1210_v59 = vclamps-f32 %v801_v30, 1.0  ;;  %v880_v33 = vsel %vm877_vm8, %v879_v29, %v875_v14 }
 0x14b   : > { %v548_v52 = vmul.f32 0.5, %v1695_v19  ;;  %v748_v8 = vmul.f32 %v1313_v24, %v1964_v18  ;;  %v856_v15 = vmul.f32 %v855_v3, %v1760_v53  ;;  %v550_v17 = vmul.f32 0.5, %v1700_v20 }
 0x14c   : > { %v884_v40 = vadd.f32 1.0, %v1205_v28  ;;  %v886_v39 = vadd.f32 1.0, %v1207_v58  ;;  %v815_v16 = vadd.f32 1.1283791, %v814_v44  ;;  %v909_v27 = vmul.f32 %v2001_v36, %v893_v38 }
 0x14d   : > { %v911_v32 = vmul.f32 %v2001_v36, %v895_v60  ;;  %v749_v51 = vsub.f32 1.0, %v748_v8  ;;  %v881_v23 = vmul.f32 %v880_v33, %v856_v15  ;;  %v758_v22 = vand.u32 2147483648, %v1964_v18 }
 0x14e   : > { %v892_v19 = vmul.f32 %v884_v40, %v548_v52  ;;  %v894_v43 = vmul.f32 %v886_v39, %v550_v17  ;;  %v889_v63 = vadd.f32 1.0, %v1210_v59  ;;  %vm753_vm9 = vweird.f32 %v1313_v24 }
 0x14f   : > { %v750_v0 = vmul.f32 %v1313_v24, %v749_v51  ;;  %v756_v20 = vand.u32 2147483647, %v1964_v18  ;;  %v736_v6 = vmul.f32 %v735_v35, %v1750_v50  ;;  %vm752_vm10 = vweird.f32 %v1964_v18 }
 0x150   : > { %v1315_v53 = vpop.eup %1314  ;;  %v908_v55 = vmul.f32 %v2010_v47, %v892_v19  ;;  %v910_v26 = vmul.f32 %v2010_v47, %v894_v43  ;;  %v917_v57 = vsel %vm360_vm1, %v909_v27, 0.0  ;;  %v926_v61 = vsel %vm360_vm1, %v911_v32, 0.0  ;;  %vm754_vm11 = vmor %vm752_vm10, %vm753_vm9 }
 0x151   : > { %v751_v1 = vadd.f32 %v1313_v24, %v750_v0  ;;  %v828_v5 = vmul.f32 %v1315_v53, %v1994_v4  ;;  %v1212_v45 = vclamps-f32 %v881_v23, 1.0  ;;  %v759_v21 = vor.u32 1.1754944e-38, %v758_v22 }
 0x152   : > { %v916_v49 = vsel %vm360_vm1, %v908_v55, 0.0  ;;  %v925_v50 = vsel %vm360_vm1, %v910_v26, 0.0  ;;  %v897_v7 = vmul.f32 %v889_v63, %v553_v31  ;;  %vm757_vm12 = vcmp.eq.f32.partialorder %v756_v20, 8.507059e+37 }
 0x153   : > { %v755_v18 = vsel %vm754_vm11, %v1313_v24, %v751_v1  ;;  %v829_v2 = vsub.f32 1.0, %v828_v5  ;;  %v838_v10 = vand.u32 2147483648, %v1994_v4  ;;  %v918_v11 = vadd.f32 %v917_v57, %v916_v49  ;;  %v955_v5 = vpop.permute.xlu2 %954 }
 0x154   : > { %v760_v9 = vsel %vm757_vm12, %v759_v21, %v755_v18  ;;  %v927_v12 = vadd.f32 %v926_v61, %v925_v50  ;;  %vm833_vm13 = vweird.f32 %v1315_v53  ;;  %v836_v13 = vand.u32 2147483647, %v1994_v4 }
 0x155   : > { %v761_v62 = vmul.f32 %v760_v9, %v736_v6  ;;  %v830_v37 = vmul.f32 %v1315_v53, %v829_v2  ;;  %v816_v56 = vmul.f32 %v815_v16, %v1757_v54  ;;  %v555_v3 = vmul.f32 0.5, %v1745_v48 }
 0x156   : > { %v891_v30 = vadd.f32 1.0, %v1212_v45  ;;  %vm832_vm14 = vweird.f32 %v1994_v4  ;;  %v552_v25 = vmul.f32 0.5, %v1733_v42  ;;  %v839_v14 = vor.u32 1.1754944e-38, %v838_v10 }
 0x157   : > { %v1209_v41 = vclamps-f32 %v761_v62, 1.0  ;;  %v831_v31 = vadd.f32 %v1315_v53, %v830_v37  ;;  %vm834_vm15 = vmor %vm832_vm14, %vm833_vm13  ;;  %v919_v28 = vrot.slane %v918_v11, 4  ;;  %v928_v34 = vrot.slane %v927_v12, 4 }
 0x158   : > { %v913_v44 = vmul.f32 %v2001_v36, %v897_v7  ;;  %vm837_vm0 = vcmp.eq.f32.partialorder %v836_v13, 8.507059e+37  ;;  %v899_v54 = vmul.f32 %v891_v30, %v555_v3  ;;  %v554_v52 = vmul.f32 0.5, %v1742_v46 }
 0x159   : > { %v835_v29 = vsel %vm834_vm15, %v1315_v53, %v831_v31  ;;  %v888_v38 = vadd.f32 1.0, %v1209_v41  ;;  %v920_v35 = vadd.f32 %v919_v28, %v918_v11  ;;  %v929_v58 = vadd.f32 %v928_v34, %v927_v12 }
 0x15a   : > { %v840_v60 = vsel %vm837_vm0, %v839_v14, %v835_v29  ;;  %v935_v59 = vsel %vm360_vm1, %v913_v44, 0.0  ;;  %v915_v33 = vmul.f32 %v2001_v36, %v899_v54  ;;  %vm961_vm2 = vcmask 516096  }
 0x15b   : > { %v841_v24 = vmul.f32 %v840_v60, %v816_v56  ;;  %v896_v48 = vmul.f32 %v888_v38, %v552_v25  ;;  %v921_v40 = vrot.slane %v920_v35, 2  ;;  %v930_v39 = vrot.slane %v929_v58, 2 }
 0x15c   : > { %v944_v32 = vsel %vm360_vm1, %v915_v33, 0.0  ;;  %vm1011_vm7 = vcmask 1041409   ;;  %vm1014_vm8 = vcmask 1042434   ;;  %vm1017_vm9 = vcmask 1043459  }
 0x15d   : > { %v1211_v4 = vclamps-f32 %v841_v24, 1.0  ;;  %v912_v42 = vmul.f32 %v2010_v47, %v896_v48  ;;  %v922_v22 = vadd.f32 %v921_v40, %v920_v35  ;;  %v931_v19 = vadd.f32 %v930_v39, %v929_v58 }
 0x15e   : > { %vm1020_vm10 = vcmask 519168  }
 0x15f   : > { %v890_v8 = vadd.f32 1.0, %v1211_v4  ;;  %v934_v15 = vsel %vm360_vm1, %v912_v42, 0.0  ;;  %v923_v0 = vrot.slane %v922_v22, 1  ;;  %v932_v20 = vrot.slane %v931_v19, 1 }
 0x160   : > { %v936_v17 = vadd.f32 %v935_v59, %v934_v15 }
 0x161   : > { %v898_v16 = vmul.f32 %v890_v8, %v554_v52  ;;  %v924_v26 = vadd.f32 %v923_v0, %v922_v22  ;;  %v933_v57 = vadd.f32 %v932_v20, %v931_v19  ;;  %v1327_v20 = vld [vmem:[%s1589_s14 + $0x8] sm:$0xff] }
 0x162   : > { %v937_v27 = vrot.slane %v936_v17, 4 }
 0x163   : > { %v914_v51 = vmul.f32 %v2010_v47, %v898_v16  ;;  %v957_v21 = vadd.f32 %v955_v5, %v924_v26  ;;  %v958_v49 = vadd.f32 %v955_v5, %v933_v57  ;;  %v1329_v26 = vld [vmem:[%s1589_s14 + $0x18] sm:$0xff] }
 0x164   : > { %v938_v23 = vadd.f32 %v937_v27, %v936_v17 }
 0x165   : > { %v943_v43 = vsel %vm360_vm1, %v914_v51, 0.0  ;;  %v962_v2 = vsel %vm961_vm2, %v957_v21, -inf  ;;  %v963_v9 = vsel %vm961_vm2, %v958_v49, -inf }
 0x166   : > { %v945_v36 = vadd.f32 %v944_v32, %v943_v43  ;;  %v939_v63 = vrot.slane %v938_v23, 2  ;;  %v966_v12 = vmax.f32 %v962_v2, %v963_v9 }
 0x168   : > { %v946_v46 = vrot.slane %v945_v36, 4  ;;  %v940_v53 = vadd.f32 %v939_v63, %v938_v23 }
 0x16a   : > { %v947_v6 = vadd.f32 %v946_v46, %v945_v36  ;;  %v941_v55 = vrot.slane %v940_v53, 1  ;;  %v1326_v46 = vld [vmem:[%s1589_s14] sm:$0xff] }
 0x16c   : > { %v942_v61 = vadd.f32 %v941_v55, %v940_v53  ;;  %v948_v1 = vrot.slane %v947_v6, 2 }
 0x16e   : > { %v949_v45 = vadd.f32 %v948_v1, %v947_v6  ;;  %v959_v50 = vadd.f32 %v955_v5, %v942_v61  ;;  %v1328_v6 = vld [vmem:[%s1589_s14 + $0x10] sm:$0xff]  ;;  %v1330_v61 = vld [vmem:[%s1589_s14 + $0x20] sm:$0xff] }
 0x170   : > { %v950_v47 = vrot.slane %v949_v45, 1  ;;  %v964_v10 = vsel %vm961_vm2, %v959_v50, -inf }
 0x172   : > { %v951_v7 = vadd.f32 %v950_v47, %v949_v45  ;;  %v1332_v47 = vld [vmem:[%s1589_s14 + $0x30] sm:$0xff] }
 0x174   : > { %v960_v18 = vadd.f32 %v955_v5, %v951_v7  ;;  %v1331_v5 = vld [vmem:[%s1589_s14 + $0x28] sm:$0xff] }
 0x176   : > { %v965_v11 = vsel %vm961_vm2, %v960_v18, -inf }
 0x177   : > { %v967_v62 = vmax.f32 %v964_v10, %v965_v11 }
 0x179   : > { %v968_v37 = vmax.f32 %v966_v12, %v967_v62 }
 0x17b   : > { %v969_v13 = vsub.f32 %v957_v21, %v968_v37  ;;  %v970_v56 = vsub.f32 %v958_v49, %v968_v37  ;;  %v971_v3 = vsub.f32 %v959_v50, %v968_v37  ;;  %v972_v30 = vsub.f32 %v960_v18, %v968_v37  ;;  %v1333_v49 = vld [vmem:[%s1589_s14 + $0x38] sm:$0xff]  ;;  %s1070_s14 = sshll.u32 %s2062_s12, 4  ;;  %s2087_s14 = int_to_ptr.hbm [resolvable:$true] %s1070_s14 }
 0x17d   : > { %v973_v41 = vmul.f32 1.442695, %v969_v13  ;;  %v975_v31 = vmul.f32 1.442695, %v970_v56  ;;  %v977_v25 = vmul.f32 1.442695, %v971_v3 }
 0x17e   : > { %v979_v14 = vmul.f32 1.442695, %v972_v30 }
 0x17f   : > { %1316 = vpow2.f32 %v973_v41 }
 0x180   : > { %1318 = vpow2.f32 %v975_v31 }
 0x181   : > { %1320 = vpow2.f32 %v977_v25 }
 0x182   : > { %1322 = vpow2.f32 %v979_v14 }
 0x185   : > { %v1317_v28 = vpop.eup %1316 }
 0x186   : > { %v1319_v34 = vpop.eup %1318  ;;  %v981_v44 = vsel %vm961_vm2, %v1317_v28, 0.0 }
 0x187   : > { %v1321_v29 = vpop.eup %1320  ;;  %v982_v38 = vsel %vm961_vm2, %v1319_v34, 0.0 }
 0x188   : > { %v1323_v60 = vpop.eup %1322  ;;  %v983_v54 = vadd.f32 %v982_v38, %v981_v44  ;;  %v984_v24 = vsel %vm961_vm2, %v1321_v29, 0.0 }
 0x189   : > { %v986_v35 = vsel %vm961_vm2, %v1323_v60, 0.0 }
 0x18a   : > { %v985_v48 = vadd.f32 %v984_v24, %v983_v54 }
 0x18c   : > { %v987_v58 = vadd.f32 %v986_v35, %v985_v48 }
 0x18e   : > { %1324 = vrcp.f32 %v987_v58  ;;  %v999_v33 = vand.u32 2147483648, %v987_v58  ;;  %v997_v8 = vand.u32 2147483647, %v987_v58  ;;  %vm993_vm4 = vweird.f32 %v987_v58 }
 0x190   : > { %v1000_v17 = vor.u32 1.1754944e-38, %v999_v33  ;;  %vm998_vm6 = vcmp.eq.f32.partialorder %v997_v8, 8.507059e+37 }
 0x194   : > { %v1325_v59 = vpop.eup %1324 }
 0x195   : > { %v989_v4 = vmul.f32 %v1325_v59, %v987_v58  ;;  %vm994_vm3 = vweird.f32 %v1325_v59 }
 0x196   : > { %vm995_vm5 = vmor %vm993_vm4, %vm994_vm3 }
 0x197   : > { %v990_v42 = vsub.f32 1.0, %v989_v4 }
 0x199   : > { %v991_v52 = vmul.f32 %v1325_v59, %v990_v42 }
 0x19b   : > { %v992_v15 = vadd.f32 %v1325_v59, %v991_v52 }
 0x19d   : > { %v996_v40 = vsel %vm995_vm5, %v1325_v59, %v992_v15 }
 0x19e   : > { %v1001_v39 = vsel %vm998_vm6, %v1000_v17, %v996_v40 }
 0x19f   : > { %v1002_v16 = vmul.f32 %v1317_v28, %v1001_v39  ;;  %v1003_v27 = vmul.f32 %v1319_v34, %v1001_v39  ;;  %v1004_v32 = vmul.f32 %v1321_v29, %v1001_v39  ;;  %v1005_v51 = vmul.f32 %v1323_v60, %v1001_v39 }
 0x1a1   : > { %v1022_v23 = vperm.slane %v1002_v16, 0  ;;  %v1023_v22 = vperm.slane %v1003_v27, 0  ;;  %v1010_v19 = vrot.slane %v1003_v27, 7  ;;  %v1013_v43 = vrot.slane %v1004_v32, 6 }
 0x1a2   : > { %v1024_v36 = vperm.slane %v1004_v32, 0  ;;  %v1025_v63 = vperm.slane %v1005_v51, 0  ;;  %v1016_v13 = vrot.slane %v1005_v51, 5 }
 0x1a3   : > { %v1026_v0 = vmul.f32 %v1326_v46, %v1022_v23  ;;  %v1027_v53 = vmul.f32 %v1327_v20, %v1022_v23  ;;  %v1028_v55 = vmul.f32 %v1328_v6, %v1023_v22  ;;  %v1029_v57 = vmul.f32 %v1329_v26, %v1023_v22 }
 0x1a4   : > { %v1030_v1 = vmul.f32 %v1330_v61, %v1024_v36  ;;  %v1031_v45 = vmul.f32 %v1331_v5, %v1024_v36  ;;  %v1032_v21 = vmul.f32 %v1332_v47, %v1025_v63  ;;  %v1033_v50 = vmul.f32 %v1333_v49, %v1025_v63 }
 0x1a5   : > { %v1034_v7 = vsel %vm360_vm1, %v1026_v0, 0.0  ;;  %v1035_v18 = vsel %vm360_vm1, %v1028_v55, 0.0  ;;  %v1041_v2 = vsel %vm360_vm1, %v1027_v53, 0.0  ;;  %v1042_v9 = vsel %vm360_vm1, %v1029_v57, 0.0 }
 0x1a6   : > { %v1036_v10 = vadd.f32 %v1035_v18, %v1034_v7  ;;  %v1043_v11 = vadd.f32 %v1042_v9, %v1041_v2  ;;  %v1037_v12 = vsel %vm360_vm1, %v1030_v1, 0.0  ;;  %v1044_v62 = vsel %vm360_vm1, %v1031_v45, 0.0 }
 0x1a7   : > { %v1012_v37 = vsel %vm1011_vm7, %v1010_v19, %v1002_v16  ;;  %v1039_v41 = vsel %vm360_vm1, %v1032_v21, 0.0  ;;  %v1046_v31 = vsel %vm360_vm1, %v1033_v50, 0.0 }
 0x1a8   : > { %v1038_v56 = vadd.f32 %v1037_v12, %v1036_v10  ;;  %v1045_v3 = vadd.f32 %v1044_v62, %v1043_v11  ;;  %v1015_v30 = vsel %vm1014_vm8, %v1013_v43, %v1012_v37 }
 0x1a9   : > { %v1018_v25 = vsel %vm1017_vm9, %v1016_v13, %v1015_v30 }
 0x1aa   : > { %v1040_v14 = vadd.f32 %v1039_v41, %v1038_v56  ;;  %v1047_v28 = vadd.f32 %v1046_v31, %v1045_v3  ;;  %1021 = vst.msk [vmem:[%s228_s13] sm:$0xf] %vm1020_vm10, %v1018_v25 }
 0x1ab   : > { %1391 = shalt.err (!%p1388_p4)
}
 0x1ac   : > { %1225 = dma.vmem_to_hbm [thread:$0]  (%p1549_p11), %s1086_s20, 64, %s1088_s22, %s1056_s30   ;;  %1048 = vst.msk [vmem:[%s2075_s23] sm:$0xff] %vm360_vm1, %v1040_v14 }
 0x1ad   : > { %1049 = vst.msk [vmem:[%s2075_s23 + $0x8] sm:$0xff] %vm360_vm1, %v1047_v28  ;;  %s1051_s19 = scalar_lea.sflag [#allocation4], %s1585_s7  ;;  %s1406_s11 = sshra.s32 %s2087_s14, 4  ;;  %s1407_s11 = int_to_ptr.hbm [resolvable:$true] %s1406_s11 }
 0x1ae   : > { %s1408_s12 = scalar_lea.hbm %s1407_s11, 16  ;;  %s1412_s29 = scalar_lea.hbm %s2140_s3, 32 }
 0x1af   : > { %p1409_p7 = scmp.ne.s32.totalorder %s1407_s11, %s1408_s12  ;;  %p1413_p10 = scmp.lt.s32.totalorder %s1407_s11, %s2140_s3 }
 0x1b0   : > { %p1414_p2 = scmp.lt.s32.totalorder %s1412_s29, %s1408_s12 }
 0x1b1   : > { %p1410_p5 = pnand %p1409_p7, %p1549_p11 }
 0x1b2   : > { %p1415_p6 = por %p1414_p2, %p1413_p10 }
 0x1b3   : > { %p1411_p8 = pneg %p1410_p5 }
 0x1b5   : > { %p1416_p9 = pnand %p1415_p6, %p1411_p8 }
 0x1b7   : > { %1419 = shalt.err (!%p1416_p9)
}
 0x1b8   : > { %s1472_s7 = smov 128   ;;  %s1473_s20 = smov 8  }
 0x1b9   : > { %1224 = dma.vmem_to_hbm [thread:$0]  (%p1549_p11), %s2085_s25, 256, %s2087_s14, %s1051_s19, %s1472_s7, %s1472_s7, %s1473_s20  }
 0x1ba PF: > { %s1099_s22 = sand.u32 1, %s1450_s15   ;;  %p2155_p13 = scmp.ge.s32.totalorder %s1462_s18, 2 }
 0x1bb   : > { %s1100_s23 = scalar_lea.sflag [#allocation4], %s1099_s22 }
 0x1bc   : > { %p1233_p0 = pnand %p2155_p13, %p1553_p12 }
 0x1be   : > { %p1234_p1 = pneg %p1233_p0 }
 0x1c0   : > { %1441 = dma.done.wait (%p1234_p1), %s1100_s23, 256  }
 0x1c1   : > { %1443 = vsyncadd (%p1234_p1), %s1100_s23, 4294967040  ;;  %s1110_s30 = scalar_lea.sflag [#allocation7], %s1099_s22 }
 0x1c2   : > { %1445 = dma.done.wait (%p1234_p1), %s1110_s30, 64  }
 0x1c3   : > { %1447 = vsyncadd (%p1234_p1), %s1110_s30, 4294967232  ;;  %p21_p11 = scmp.ge.s32.totalorder %s1524_s21, 4   ;;  %s2156_s15 = smov %s1454_s16 }
 0x1c4   : > { %s2157_s16 = smov %s1458_s17  ;;  %s2158_s17 = smov %s1536_s24 }
 0x1c5   : > { %s2159_s18 = smov %s1524_s21  ;;  %23 = sbr.rel (!%p21_p11) target bundleno = 7 (0x7), region = 94 }
 0x1ca   :  { %1116 = vsyncpa [#allocation3], 1 }
 0x1cb   :  { %1118 = vsyncpa [#allocation3 + $0x1], 1 }
 0x1cc   :  { %1119 = vsyncpa [#allocation4], 1 }
 0x1cd   :  { %1121 = vsyncpa [#allocation4 + $0x1], 1 }
 0x1ce   :  { %1122 = vsyncpa [#allocation7], 1 }
 0x1cf   :  { %1124 = vsyncpa [#allocation7 + $0x1], 1 }

</bundles_post_ra>
